<compile_context>
chip_gen: v7x
topology: tpu7x:2x2x1
jax: 0.10.0
libtpu: 0.0.40
codegen_flags: <defaults>
</compile_context>

<pallas_src>
import functools
import math

import jax
import jax.numpy as jnp
from jax import lax
from jax.experimental import pallas as pl
from jax.experimental.pallas import tpu as pltpu


# ----------------------------------------------------------------------------
# Tiling helpers
# ----------------------------------------------------------------------------
def _col_tile(n, max_tile=2048):
    """Pick a lane-axis tile that divides n (multiple of 128 when tiling)."""
    if n <= max_tile:
        return n
    for t in (2048, 1024, 512, 256, 128):
        if n % t == 0:
            return t
    return n


def _row_tile(m, max_tile=1024):
    if m <= max_tile:
        return m
    for t in (1024, 512, 256, 128, 64, 32, 16, 8):
        if m % t == 0:
            return t
    return m


# ----------------------------------------------------------------------------
# Fused transformer decoder layer kernel
#   cross-attn(identity, tgt, memory) -> LN -> self-attn -> LN -> FFN -> LN
# ----------------------------------------------------------------------------
def _decoder_layer_kernel(idn_ref, tgt_ref, mem_ref,
                          c_wqkv, c_bqkv, c_wo, c_bo, c_g, c_b,
                          s_wqkv, s_bqkv, s_wo, s_bo, s_g, s_b,
                          f_w1, f_b1, f_w2, f_b2, f_g, f_b,
                          o_ref, *, num_heads, eps):
    C = idn_ref.shape[-1]
    Dh = C // num_heads
    scale = 1.0 / math.sqrt(Dh)

    def layernorm(x, g, b):
        mean = jnp.mean(x, axis=-1, keepdims=True)
        xc = x - mean
        var = jnp.mean(xc * xc, axis=-1, keepdims=True)
        return xc * lax.rsqrt(var + eps) * g + b

    def matmul_nt(a, b):  # a @ b.T (avoids explicit transpose relayout)
        return lax.dot_general(a, b, (((1,), (1,)), ((), ())),
                               preferred_element_type=jnp.float32)

    # head-channel masks built once (no lane slicing / reshapes needed)
    ch = lax.broadcasted_iota(jnp.int32, (1, C), 1)

    def mha(x_q, x_kv, wqkv_ref, bqkv_ref, wo, bo):
        q = jnp.dot(x_q, wqkv_ref[0], preferred_element_type=jnp.float32) + bqkv_ref[0]
        k = jnp.dot(x_kv, wqkv_ref[1], preferred_element_type=jnp.float32) + bqkv_ref[1]
        v = jnp.dot(x_kv, wqkv_ref[2], preferred_element_type=jnp.float32) + bqkv_ref[2]
        acc = jnp.zeros_like(q)
        for h in range(num_heads):
            m = jnp.where((ch >= h * Dh) & (ch < (h + 1) * Dh), 1.0, 0.0)
            s = matmul_nt(q * m, k) * scale            # per-head scores (Lq, Lk)
            s = s - jnp.max(s, axis=-1, keepdims=True)
            p = jnp.exp(s)
            p = p / jnp.sum(p, axis=-1, keepdims=True)
            # v*m zeroes other heads' channels -> summing heads == concat
            acc = acc + jnp.dot(p, v * m, preferred_element_type=jnp.float32)
        return jnp.dot(acc, wo, preferred_element_type=jnp.float32) + bo

    identity = idn_ref[0]
    tgt = tgt_ref[0]
    memory = mem_ref[0]

    # cross-attention (query=tgt, key/value=memory), residual against identity
    x = identity + mha(tgt, memory, c_wqkv, c_bqkv, c_wo[...], c_bo[...])
    x = layernorm(x, c_g[...], c_b[...])
    # self-attention
    x = x + mha(x, x, s_wqkv, s_bqkv, s_wo[...], s_bo[...])
    x = layernorm(x, s_g[...], s_b[...])
    # FFN (relu)
    h = jnp.maximum(jnp.dot(x, f_w1[...], preferred_element_type=jnp.float32) + f_b1[...], 0.0)
    y = jnp.dot(h, f_w2[...], preferred_element_type=jnp.float32) + f_b2[...]
    x = layernorm(x + y, f_g[...], f_b[...])
    o_ref[0] = x


def decoder_layer(p, identity, tgt, memory, num_heads):
    """identity/tgt: (Lq, B, C), memory: (Lk, B, C) in PyTorch (L, B, C) layout."""
    Lq, B, C = tgt.shape
    Lk = memory.shape[0]
    idb = jnp.transpose(identity, (1, 0, 2))
    tgb = jnp.transpose(tgt, (1, 0, 2))
    meb = jnp.transpose(memory, (1, 0, 2))

    cross, self_, ffn = p["cross"], p["self"], p["ffn"]

    def attn_specs(ap):
        return [pl.BlockSpec(ap["wqkv"].shape, lambda b: (0, 0, 0)),
                pl.BlockSpec(ap["bqkv"].shape, lambda b: (0, 0, 0)),
                pl.BlockSpec(ap["wo"].shape, lambda b: (0, 0)),
                pl.BlockSpec(ap["bo"].shape, lambda b: (0, 0)),
                pl.BlockSpec(ap["g"].shape, lambda b: (0, 0)),
                pl.BlockSpec(ap["b"].shape, lambda b: (0, 0))]

    ffn_specs = [pl.BlockSpec(ffn["w1"].shape, lambda b: (0, 0)),
                 pl.BlockSpec(ffn["b1"].shape, lambda b: (0, 0)),
                 pl.BlockSpec(ffn["w2"].shape, lambda b: (0, 0)),
                 pl.BlockSpec(ffn["b2"].shape, lambda b: (0, 0)),
                 pl.BlockSpec(ffn["g"].shape, lambda b: (0, 0)),
                 pl.BlockSpec(ffn["b"].shape, lambda b: (0, 0))]

    out = pl.pallas_call(
        functools.partial(_decoder_layer_kernel, num_heads=num_heads, eps=1e-5),
        out_shape=jax.ShapeDtypeStruct((B, Lq, C), jnp.float32),
        grid=(B,),
        in_specs=[pl.BlockSpec((1, Lq, C), lambda b: (b, 0, 0)),
                  pl.BlockSpec((1, Lq, C), lambda b: (b, 0, 0)),
                  pl.BlockSpec((1, Lk, C), lambda b: (b, 0, 0))]
                 + attn_specs(cross) + attn_specs(self_) + ffn_specs,
        out_specs=pl.BlockSpec((1, Lq, C), lambda b: (b, 0, 0)),
        compiler_params=pltpu.CompilerParams(dimension_semantics=("parallel",)),
    )(idb, tgb, meb,
      cross["wqkv"], cross["bqkv"], cross["wo"], cross["bo"], cross["g"], cross["b"],
      self_["wqkv"], self_["bqkv"], self_["wo"], self_["bo"], self_["g"], self_["b"],
      ffn["w1"], ffn["b1"], ffn["w2"], ffn["b2"], ffn["g"], ffn["b"])
    return jnp.transpose(out, (1, 0, 2))


# ----------------------------------------------------------------------------
# Fused prediction head: decoder_norm + class_embed + mask_embed MLP
# ----------------------------------------------------------------------------
def _pred_head_kernel(x_ref, dng, dnb, cw, cb, m0w, m0b, m1w, m1b, m2w, m2b,
                      cls_ref, me_ref, *, eps):
    x = x_ref[...]
    mean = jnp.mean(x, axis=-1, keepdims=True)
    xc = x - mean
    var = jnp.mean(xc * xc, axis=-1, keepdims=True)
    x = xc * lax.rsqrt(var + eps) * dng[...] + dnb[...]
    cls_ref[...] = jnp.dot(x, cw[...], preferred_element_type=jnp.float32) + cb[...]
    h = jnp.maximum(jnp.dot(x, m0w[...], preferred_element_type=jnp.float32) + m0b[...], 0.0)
    h = jnp.maximum(jnp.dot(h, m1w[...], preferred_element_type=jnp.float32) + m1b[...], 0.0)
    me_ref[...] = jnp.dot(h, m2w[...], preferred_element_type=jnp.float32) + m2b[...]


# ----------------------------------------------------------------------------
# Mask einsum 'lbtqc,btchw->lbqthw' as batched matmul (mask_features reused via
# index_map instead of broadcasting over L)
# ----------------------------------------------------------------------------
def _mask_bmm_kernel(me_ref, mf_ref, o_ref):
    o_ref[0] = jnp.dot(me_ref[0], mf_ref[0], preferred_element_type=jnp.float32)


def mask_einsum(me, mf_flat, H, W):
    # me: (L, B, T, Q, Cm);  mf_flat: (B*T, Cm, H*W)
    L, B, T, Q, Cm = me.shape
    HW = H * W
    BT = B * T
    G = L * BT
    me_flat = me.reshape(G, Q, Cm)
    hw_t = _col_tile(HW)
    nj = HW // hw_t
    out = pl.pallas_call(
        _mask_bmm_kernel,
        out_shape=jax.ShapeDtypeStruct((G, Q, HW), jnp.float32),
        grid=(G, nj),
        in_specs=[pl.BlockSpec((1, Q, Cm), lambda g, j: (g, 0, 0)),
                  pl.BlockSpec((1, Cm, hw_t), lambda g, j: (g % BT, 0, j))],
        out_specs=pl.BlockSpec((1, Q, hw_t), lambda g, j: (g, 0, j)),
        compiler_params=pltpu.CompilerParams(
            dimension_semantics=("parallel", "parallel")),
    )(me_flat, mf_flat)
    return out.reshape(L, B, T, Q, H, W)


# ----------------------------------------------------------------------------
# 1x1 Conv2d on mask_features, channels-first (lane axis = H*W, lane-dense)
# ----------------------------------------------------------------------------
def _conv1x1_kernel(x_ref, w_ref, b_ref, o_ref):
    o_ref[0] = (jnp.dot(w_ref[...], x_ref[0], preferred_element_type=jnp.float32)
                + b_ref[...])


def conv1x1_cf(x_flat, w, b):
    """x_flat: (N, Cin, HW);  w: (Cout, Cin);  b: (Cout, 1) -> (N, Cout, HW)."""
    N, Cin, HW = x_flat.shape
    Cout = w.shape[0]
    hw_t = _col_tile(HW)
    nj = HW // hw_t
    return pl.pallas_call(
        _conv1x1_kernel,
        out_shape=jax.ShapeDtypeStruct((N, Cout, HW), jnp.float32),
        grid=(N, nj),
        in_specs=[pl.BlockSpec((1, Cin, hw_t), lambda n, j: (n, 0, j)),
                  pl.BlockSpec((Cout, Cin), lambda n, j: (0, 0)),
                  pl.BlockSpec((Cout, 1), lambda n, j: (0, 0))],
        out_specs=pl.BlockSpec((1, Cout, hw_t), lambda n, j: (n, 0, j)),
        compiler_params=pltpu.CompilerParams(
            dimension_semantics=("parallel", "parallel")),
    )(x_flat.astype(jnp.float32), w, b)


# ----------------------------------------------------------------------------
# Noiser (activate=False): cosine-cost matching ref -> cur
# ----------------------------------------------------------------------------
def noiser_match(ref_embds, cur_embds):
    """TODO(synk): exact module uses scipy.optimize.linear_sum_assignment
    (Hungarian); approximated here by greedy assignment on the identical
    cosine-cost matrix (exact on the first frame, where ref == cur)."""
    Q = ref_embds.shape[0]
    r = ref_embds[:, 0, :]
    c = cur_embds[:, 0, :]
    r = r / (jnp.linalg.norm(r, axis=1, keepdims=True) + 1e-6)
    c = c / (jnp.linalg.norm(c, axis=1, keepdims=True) + 1e-6)
    cos = jnp.dot(c, r.T)                       # (cur, ref) -- tiny, plain jnp
    cost = (1.0 - cos).T                        # (ref, cur)
    cost = jnp.where(jnp.isnan(cost), 0.0, cost)

    def body(j, carry):
        assigned, idxs = carry
        row = jnp.where(assigned, jnp.inf, cost[j])
        pick = jnp.argmin(row)
        idxs = idxs.at[j].set(pick.astype(jnp.int32))
        assigned = assigned.at[pick].set(True)
        return assigned, idxs

    assigned0 = jnp.zeros((Q,), dtype=bool)
    idxs0 = jnp.zeros((Q,), dtype=jnp.int32)
    _, idxs = lax.fori_loop(0, Q, body, (assigned0, idxs0))
    return idxs


# ----------------------------------------------------------------------------
# Parameter init (deterministic, synthetic)
# ----------------------------------------------------------------------------
def _dense_init(key, fan_in, fan_out):
    kw, kb = jax.random.split(key)
    limit = 1.0 / math.sqrt(fan_in)
    w = jax.random.uniform(kw, (fan_in, fan_out), jnp.float32, -limit, limit)
    b = jax.random.uniform(kb, (1, fan_out), jnp.float32, -limit, limit)
    return w, b


def _attn_init(key, C):
    ks = jax.random.split(key, 4)
    wq, bq = _dense_init(ks[0], C, C)
    wk, bk = _dense_init(ks[1], C, C)
    wv, bv = _dense_init(ks[2], C, C)
    wo, bo = _dense_init(ks[3], C, C)
    return {"wqkv": jnp.stack([wq, wk, wv], axis=0),   # (3, C, C), used as x @ w
            "bqkv": jnp.stack([bq, bk, bv], axis=0),   # (3, 1, C)
            "wo": wo, "bo": bo,
            "g": jnp.ones((1, C), jnp.float32), "b": jnp.zeros((1, C), jnp.float32)}


def init_params(key, hidden, ffn_dim, num_layers, mask_dim, num_classes):
    keys = jax.random.split(key, num_layers + 5)
    layers = []
    for j in range(num_layers):
        kc, ks, kf1, kf2 = jax.random.split(keys[j], 4)
        w1, b1 = _dense_init(kf1, hidden, ffn_dim)
        w2, b2 = _dense_init(kf2, ffn_dim, hidden)
        layers.append({
            "cross": _attn_init(kc, hidden),
            "self": _attn_init(ks, hidden),
            "ffn": {"w1": w1, "b1": b1, "w2": w2, "b2": b2,
                    "g": jnp.ones((1, hidden), jnp.float32),
                    "b": jnp.zeros((1, hidden), jnp.float32)},
        })
    kp = keys[num_layers:]
    # conv weight kept channels-first: (Cout, Cin), bias (Cout, 1)
    kcw, kcb = jax.random.split(kp[0])
    limit = 1.0 / math.sqrt(mask_dim)
    conv_w = jax.random.uniform(kcw, (mask_dim, mask_dim), jnp.float32, -limit, limit)
    conv_b = jax.random.uniform(kcb, (mask_dim, 1), jnp.float32, -limit, limit)
    ce_w, ce_b = _dense_init(kp[1], hidden, num_classes + 1)
    m0 = _dense_init(kp[2], hidden, hidden)
    m1 = _dense_init(kp[3], hidden, hidden)
    m2 = _dense_init(kp[4], hidden, mask_dim)
    return {
        "layers": layers,
        "mask_feature_proj": (conv_w, conv_b),
        "decoder_norm": (jnp.ones((1, hidden), jnp.float32),
                         jnp.zeros((1, hidden), jnp.float32)),
        "class_embed": (ce_w, ce_b),
        "mask_embed": [m0, m1, m2],
    }


# ----------------------------------------------------------------------------
# prediction() — fused head + mask einsum
# ----------------------------------------------------------------------------
def prediction(params, outputs, mf_flat, H, W):
    # outputs: (T, L, Q, B, C);  mf_flat (projected): (B*T, Cm, H*W)
    T, L, Q, B, C = outputs.shape
    dec = jnp.transpose(outputs, (1, 3, 0, 2, 4))    # (L, B, T, Q, C)
    M = L * B * T * Q
    x = dec.reshape(M, C)

    dng, dnb = params["decoder_norm"]
    cw, cb = params["class_embed"]
    (m0w, m0b), (m1w, m1b), (m2w, m2b) = params["mask_embed"]
    K = cw.shape[1]
    Cm = m2w.shape[1]

    mt = _row_tile(M)
    weight_args = (dng, dnb, cw, cb, m0w, m0b, m1w, m1b, m2w, m2b)
    cls, me = pl.pallas_call(
        functools.partial(_pred_head_kernel, eps=1e-5),
        out_shape=(jax.ShapeDtypeStruct((M, K), jnp.float32),
                   jax.ShapeDtypeStruct((M, Cm), jnp.float32)),
        grid=(M // mt,),
        in_specs=[pl.BlockSpec((mt, C), lambda i: (i, 0))] +
                 [pl.BlockSpec(a.shape, lambda i: (0, 0)) for a in weight_args],
        out_specs=(pl.BlockSpec((mt, K), lambda i: (i, 0)),
                   pl.BlockSpec((mt, Cm), lambda i: (i, 0))),
        compiler_params=pltpu.CompilerParams(dimension_semantics=("parallel",)),
    )(x, *weight_args)

    outputs_class = jnp.transpose(cls.reshape(L, B, T, Q, K), (0, 1, 3, 2, 4))
    me = me.reshape(L, B, T, Q, Cm)
    masks = mask_einsum(me, mf_flat, H, W)                  # (L, B, T, Q, H, W)
    outputs_mask = jnp.transpose(masks, (0, 1, 3, 2, 4, 5))  # (L, B, Q, T, H, W)
    return outputs_class, outputs_mask


# ----------------------------------------------------------------------------
# ReferringTracker_noiser_clip forward (eval mode, feature_refusion=False)
# ----------------------------------------------------------------------------
def referring_tracker_forward(params, frame_embeds, mask_features,
                              resume=False, clip_size=2, num_heads=4):
    # frame_embeds: (B, C, T, Q); mask_features: (B, T, Cm, H, W)
    B, T, Cm, H, W = mask_features.shape
    HW = H * W
    conv_w, conv_b = params["mask_feature_proj"]
    mf_flat = conv1x1_cf(mask_features.reshape(B * T, Cm, HW), conv_w, conv_b)

    fe = jnp.transpose(frame_embeds, (2, 3, 0, 1)).astype(jnp.float32)  # (T, Q, B, C)
    n_frame, Q, Bq, C = fe.shape
    num_layers = len(params["layers"])

    outputs = []
    last_outputs = None
    last_frame_embeds = None
    for i in range(n_frame):
        if i % clip_size != 0:
            continue
        sfe = fe[i]
        sfe_nn = sfe                                 # frame_embeds_no_norm is None
        first = (i == 0) and (not resume)
        if first:
            last_outputs = None                      # _clear_memory()
        ms_output = []
        for j in range(num_layers):
            if j == 0:
                ref = sfe if first else last_frame_embeds
                indices = noiser_match(ref, sfe)
                noised_init = sfe_nn[indices]        # activate=False -> no noise
                ms_output.append(sfe_nn[indices])
                last_frame_embeds = sfe[indices]
                tgt_src = sfe_nn if first else last_outputs[-1]
                out = decoder_layer(params["layers"][j], noised_init, tgt_src,
                                    sfe_nn, num_heads)
            else:
                identity = ms_output[-1]
                tgt_src = ms_output[-1] if first else last_outputs[-1]
                out = decoder_layer(params["layers"][j], identity, tgt_src,
                                    sfe_nn, num_heads)
            ms_output.append(out)
        ms_output = jnp.stack(ms_output, axis=0)     # (num_layers+1, Q, B, C)
        last_outputs = ms_output
        outputs += [ms_output[1:]] * clip_size
    outputs = outputs[:n_frame]
    outputs = jnp.stack(outputs, axis=0)             # (T, num_layers, Q, B, C)

    # eval-mode: keep only the last decoder layer
    outputs = outputs[:, -1:]

    outputs_class, outputs_mask = prediction(params, outputs, mf_flat, H, W)
    L = outputs_class.shape[0]
    aux = [{"pred_logits": jnp.swapaxes(outputs_class[l], 1, 2),
            "pred_masks": outputs_mask[l]} for l in range(L - 1)]
    return {
        "pred_logits": jnp.swapaxes(outputs_class[-1], 1, 2),   # (B, T, Q, cls+1)
        "pred_masks": outputs_mask[-1],                         # (B, Q, T, H, W)
        "aux_outputs": aux,
        "pred_embds": jnp.transpose(outputs[:, -1], (2, 3, 0, 1)),  # (B, C, T, Q)
    }


# ----------------------------------------------------------------------------
if __name__ == "__main__":
    key = jax.random.PRNGKey(0)
    kp, kf, km = jax.random.split(key, 3)

    hidden, ffn_dim, num_heads, num_layers = 32, 64, 4, 2
    mask_dim, num_classes = 32, 5
    B, C, T, Q = 1, hidden, 4, 8
    H = W = 16

    params = init_params(kp, hidden, ffn_dim, num_layers, mask_dim, num_classes)
    frame_embeds = jax.random.normal(kf, (B, C, T, Q), jnp.float32)
    mask_features = jax.random.normal(km, (B, T, mask_dim, H, W), jnp.float32)

    fwd = jax.jit(referring_tracker_forward,
                  static_argnames=("resume", "clip_size", "num_heads"))
    out = fwd(params, frame_embeds, mask_features,
              resume=False, clip_size=2, num_heads=num_heads)
    jax.block_until_ready(out["pred_logits"])
    jax.block_until_ready(out["pred_masks"])
    jax.block_until_ready(out["pred_embds"])

    assert out["pred_logits"].shape == (B, T, Q, num_classes + 1)
    assert out["pred_masks"].shape == (B, Q, T, H, W)
    assert out["pred_embds"].shape == (B, C, T, Q)
    print("KERNEL_OK")
</pallas_src>

<mosaic_0001>
module attributes {stable_mosaic.version = 11 : i64} {
  func.func @_decoder_layer_kernel(%arg0: i32, %arg1: memref<1x8x32xf32, #tpu.memory_space<vmem>>, %arg2: memref<1x8x32xf32, #tpu.memory_space<vmem>>, %arg3: memref<1x8x32xf32, #tpu.memory_space<vmem>>, %arg4: memref<3x32x32xf32, #tpu.memory_space<vmem>>, %arg5: memref<3x1x32xf32, #tpu.memory_space<vmem>>, %arg6: memref<32x32xf32, #tpu.memory_space<vmem>>, %arg7: memref<1x32xf32, #tpu.memory_space<vmem>>, %arg8: memref<1x32xf32, #tpu.memory_space<vmem>>, %arg9: memref<1x32xf32, #tpu.memory_space<vmem>>, %arg10: memref<3x32x32xf32, #tpu.memory_space<vmem>>, %arg11: memref<3x1x32xf32, #tpu.memory_space<vmem>>, %arg12: memref<32x32xf32, #tpu.memory_space<vmem>>, %arg13: memref<1x32xf32, #tpu.memory_space<vmem>>, %arg14: memref<1x32xf32, #tpu.memory_space<vmem>>, %arg15: memref<1x32xf32, #tpu.memory_space<vmem>>, %arg16: memref<32x64xf32, #tpu.memory_space<vmem>>, %arg17: memref<1x64xf32, #tpu.memory_space<vmem>>, %arg18: memref<64x32xf32, #tpu.memory_space<vmem>>, %arg19: memref<1x32xf32, #tpu.memory_space<vmem>>, %arg20: memref<1x32xf32, #tpu.memory_space<vmem>>, %arg21: memref<1x32xf32, #tpu.memory_space<vmem>>, %arg22: memref<1x8x32xf32, #tpu.memory_space<vmem>>) attributes {dimension_semantics = [#tpu.dimension_semantics<parallel>], iteration_bounds = array<i64: 1>, scalar_prefetch = 0 : i64, scratch_operands = 0 : i64, tpu.core_type = #tpu.core_type<tc>, window_params = [{transform_indices = @transform_0, window_bounds = array<i64: 1, 8, 32>}, {transform_indices = @transform_1, window_bounds = array<i64: 1, 8, 32>}, {transform_indices = @transform_2, window_bounds = array<i64: 1, 8, 32>}, {pipeline_mode = #tpu.pipeline_mode<synchronous>, transform_indices = @transform_3, window_bounds = array<i64: 3, 32, 32>}, {pipeline_mode = #tpu.pipeline_mode<synchronous>, transform_indices = @transform_4, window_bounds = array<i64: 3, 1, 32>}, {pipeline_mode = #tpu.pipeline_mode<synchronous>, transform_indices = @transform_5, window_bounds = array<i64: 32, 32>}, {pipeline_mode = #tpu.pipeline_mode<synchronous>, transform_indices = @transform_6, window_bounds = array<i64: 1, 32>}, {pipeline_mode = #tpu.pipeline_mode<synchronous>, transform_indices = @transform_7, window_bounds = array<i64: 1, 32>}, {pipeline_mode = #tpu.pipeline_mode<synchronous>, transform_indices = @transform_8, window_bounds = array<i64: 1, 32>}, {pipeline_mode = #tpu.pipeline_mode<synchronous>, transform_indices = @transform_9, window_bounds = array<i64: 3, 32, 32>}, {pipeline_mode = #tpu.pipeline_mode<synchronous>, transform_indices = @transform_10, window_bounds = array<i64: 3, 1, 32>}, {pipeline_mode = #tpu.pipeline_mode<synchronous>, transform_indices = @transform_11, window_bounds = array<i64: 32, 32>}, {pipeline_mode = #tpu.pipeline_mode<synchronous>, transform_indices = @transform_12, window_bounds = array<i64: 1, 32>}, {pipeline_mode = #tpu.pipeline_mode<synchronous>, transform_indices = @transform_13, window_bounds = array<i64: 1, 32>}, {pipeline_mode = #tpu.pipeline_mode<synchronous>, transform_indices = @transform_14, window_bounds = array<i64: 1, 32>}, {pipeline_mode = #tpu.pipeline_mode<synchronous>, transform_indices = @transform_15, window_bounds = array<i64: 32, 64>}, {pipeline_mode = #tpu.pipeline_mode<synchronous>, transform_indices = @transform_16, window_bounds = array<i64: 1, 64>}, {pipeline_mode = #tpu.pipeline_mode<synchronous>, transform_indices = @transform_17, window_bounds = array<i64: 64, 32>}, {pipeline_mode = #tpu.pipeline_mode<synchronous>, transform_indices = @transform_18, window_bounds = array<i64: 1, 32>}, {pipeline_mode = #tpu.pipeline_mode<synchronous>, transform_indices = @transform_19, window_bounds = array<i64: 1, 32>}, {pipeline_mode = #tpu.pipeline_mode<synchronous>, transform_indices = @transform_20, window_bounds = array<i64: 1, 32>}, {transform_indices = @transform_21, window_bounds = array<i64: 1, 8, 32>}]} {
    %0 = tpu.iota {dimensions = array<i32: 1>} : vector<1x32xi32>
    %c0 = arith.constant 0 : index
    %c0_0 = arith.constant 0 : index
    %c0_1 = arith.constant 0 : index
    %1 = vector.load %arg1[%c0, %c0_0, %c0_1] : memref<1x8x32xf32, #tpu.memory_space<vmem>>, vector<1x8x32xf32>
    %2 = vector.shape_cast %1 : vector<1x8x32xf32> to vector<8x32xf32>
    %c0_2 = arith.constant 0 : index
    %c0_3 = arith.constant 0 : index
    %c0_4 = arith.constant 0 : index
    %3 = vector.load %arg2[%c0_2, %c0_3, %c0_4] : memref<1x8x32xf32, #tpu.memory_space<vmem>>, vector<1x8x32xf32>
    %4 = vector.shape_cast %3 : vector<1x8x32xf32> to vector<8x32xf32>
    %c0_5 = arith.constant 0 : index
    %c0_6 = arith.constant 0 : index
    %c0_7 = arith.constant 0 : index
    %5 = vector.load %arg3[%c0_5, %c0_6, %c0_7] : memref<1x8x32xf32, #tpu.memory_space<vmem>>, vector<1x8x32xf32>
    %6 = vector.shape_cast %5 : vector<1x8x32xf32> to vector<8x32xf32>
    %c0_8 = arith.constant 0 : index
    %c0_9 = arith.constant 0 : index
    %7 = vector.load %arg6[%c0_8, %c0_9] : memref<32x32xf32, #tpu.memory_space<vmem>>, vector<32x32xf32>
    %c0_10 = arith.constant 0 : index
    %c0_11 = arith.constant 0 : index
    %8 = vector.load %arg7[%c0_10, %c0_11] : memref<1x32xf32, #tpu.memory_space<vmem>>, vector<1x32xf32>
    %c0_12 = arith.constant 0 : index
    %c0_13 = arith.constant 0 : index
    %c0_14 = arith.constant 0 : index
    %9 = vector.load %arg4[%c0_12, %c0_13, %c0_14] : memref<3x32x32xf32, #tpu.memory_space<vmem>>, vector<1x32x32xf32>
    %10 = vector.shape_cast %9 : vector<1x32x32xf32> to vector<32x32xf32>
    %cst = arith.constant dense<0.000000e+00> : vector<8x32xf32>
    %11 = tpu.matmul %4, %10, %cst {dimension_numbers = #tpu.dot_dimension_numbers<[1], [0], [0], [1], [0, 0, 1, 1], [], []>} : vector<8x32xf32>, vector<32x32xf32>, vector<8x32xf32> -> vector<8x32xf32>
    %c0_15 = arith.constant 0 : index
    %c0_16 = arith.constant 0 : index
    %c0_17 = arith.constant 0 : index
    %12 = vector.load %arg5[%c0_15, %c0_16, %c0_17] : memref<3x1x32xf32, #tpu.memory_space<vmem>>, vector<1x1x32xf32>
    %13 = vector.shape_cast %12 : vector<1x1x32xf32> to vector<1x32xf32>
    %14 = vector.broadcast %13 : vector<1x32xf32> to vector<8x32xf32>
    %15 = arith.addf %11, %14 : vector<8x32xf32>
    %c1 = arith.constant 1 : index
    %c0_18 = arith.constant 0 : index
    %c0_19 = arith.constant 0 : index
    %16 = vector.load %arg4[%c1, %c0_18, %c0_19] : memref<3x32x32xf32, #tpu.memory_space<vmem>>, vector<1x32x32xf32>
    %17 = vector.shape_cast %16 : vector<1x32x32xf32> to vector<32x32xf32>
    %cst_20 = arith.constant dense<0.000000e+00> : vector<8x32xf32>
    %18 = tpu.matmul %6, %17, %cst_20 {dimension_numbers = #tpu.dot_dimension_numbers<[1], [0], [0], [1], [0, 0, 1, 1], [], []>} : vector<8x32xf32>, vector<32x32xf32>, vector<8x32xf32> -> vector<8x32xf32>
    %c1_21 = arith.constant 1 : index
    %c0_22 = arith.constant 0 : index
    %c0_23 = arith.constant 0 : index
    %19 = vector.load %arg5[%c1_21, %c0_22, %c0_23] : memref<3x1x32xf32, #tpu.memory_space<vmem>>, vector<1x1x32xf32>
    %20 = vector.shape_cast %19 : vector<1x1x32xf32> to vector<1x32xf32>
    %21 = vector.broadcast %20 : vector<1x32xf32> to vector<8x32xf32>
    %22 = arith.addf %18, %21 : vector<8x32xf32>
    %c2 = arith.constant 2 : index
    %c0_24 = arith.constant 0 : index
    %c0_25 = arith.constant 0 : index
    %23 = vector.load %arg4[%c2, %c0_24, %c0_25] : memref<3x32x32xf32, #tpu.memory_space<vmem>>, vector<1x32x32xf32>
    %24 = vector.shape_cast %23 : vector<1x32x32xf32> to vector<32x32xf32>
    %cst_26 = arith.constant dense<0.000000e+00> : vector<8x32xf32>
    %25 = tpu.matmul %6, %24, %cst_26 {dimension_numbers = #tpu.dot_dimension_numbers<[1], [0], [0], [1], [0, 0, 1, 1], [], []>} : vector<8x32xf32>, vector<32x32xf32>, vector<8x32xf32> -> vector<8x32xf32>
    %c2_27 = arith.constant 2 : index
    %c0_28 = arith.constant 0 : index
    %c0_29 = arith.constant 0 : index
    %26 = vector.load %arg5[%c2_27, %c0_28, %c0_29] : memref<3x1x32xf32, #tpu.memory_space<vmem>>, vector<1x1x32xf32>
    %27 = vector.shape_cast %26 : vector<1x1x32xf32> to vector<1x32xf32>
    %28 = vector.broadcast %27 : vector<1x32xf32> to vector<8x32xf32>
    %29 = arith.addf %25, %28 : vector<8x32xf32>
    %cst_30 = arith.constant 0.000000e+00 : f32
    %30 = vector.broadcast %cst_30 : f32 to vector<8x32xf32>
    %c0_i32 = arith.constant 0 : i32
    %31 = vector.broadcast %c0_i32 : i32 to vector<1x32xi32>
    %32 = arith.cmpi sge, %0, %31 : vector<1x32xi32>
    %c8_i32 = arith.constant 8 : i32
    %33 = vector.broadcast %c8_i32 : i32 to vector<1x32xi32>
    %34 = arith.cmpi slt, %0, %33 : vector<1x32xi32>
    %35 = arith.andi %32, %34 : vector<1x32xi1>
    %cst_31 = arith.constant 1.000000e+00 : f32
    %cst_32 = arith.constant 0.000000e+00 : f32
    %36 = vector.broadcast %cst_31 : f32 to vector<1x32xf32>
    %37 = vector.broadcast %cst_32 : f32 to vector<1x32xf32>
    %38 = arith.select %35, %36, %37 : vector<1x32xi1>, vector<1x32xf32>
    %39 = vector.broadcast %38 : vector<1x32xf32> to vector<8x32xf32>
    %40 = arith.mulf %15, %39 : vector<8x32xf32>
    %cst_33 = arith.constant dense<0.000000e+00> : vector<8x8xf32>
    %41 = tpu.matmul %40, %22, %cst_33 {dimension_numbers = #tpu.dot_dimension_numbers<[1], [1], [0], [0], [0, 0, 1, 0], [], []>} : vector<8x32xf32>, vector<8x32xf32>, vector<8x8xf32> -> vector<8x8xf32>
    %cst_34 = arith.constant 0.353553385 : f32
    %42 = vector.broadcast %cst_34 : f32 to vector<8x8xf32>
    %43 = arith.mulf %41, %42 : vector<8x8xf32>
    %cst_35 = arith.constant dense<0xFF800000> : vector<8xf32>
    %44 = vector.multi_reduction <maximumf>, %43, %cst_35 [1] : vector<8x8xf32> to vector<8xf32>
    %45 = vector.shape_cast %44 : vector<8xf32> to vector<8x1xf32>
    %46 = vector.broadcast %45 : vector<8x1xf32> to vector<8x8xf32>
    %47 = arith.subf %43, %46 : vector<8x8xf32>
    %48 = math.exp %47 : vector<8x8xf32>
    %cst_36 = arith.constant dense<0.000000e+00> : vector<8xf32>
    %49 = vector.multi_reduction <add>, %48, %cst_36 [1] : vector<8x8xf32> to vector<8xf32>
    %50 = vector.shape_cast %49 : vector<8xf32> to vector<8x1xf32>
    %51 = vector.broadcast %50 : vector<8x1xf32> to vector<8x8xf32>
    %52 = arith.divf %48, %51 : vector<8x8xf32>
    %53 = vector.broadcast %38 : vector<1x32xf32> to vector<8x32xf32>
    %54 = arith.mulf %29, %53 : vector<8x32xf32>
    %cst_37 = arith.constant dense<0.000000e+00> : vector<8x32xf32>
    %55 = tpu.matmul %52, %54, %cst_37 {dimension_numbers = #tpu.dot_dimension_numbers<[1], [0], [0], [1], [0, 0, 1, 1], [], []>} : vector<8x8xf32>, vector<8x32xf32>, vector<8x32xf32> -> vector<8x32xf32>
    %56 = arith.addf %30, %55 : vector<8x32xf32>
    %c8_i32_38 = arith.constant 8 : i32
    %57 = vector.broadcast %c8_i32_38 : i32 to vector<1x32xi32>
    %58 = arith.cmpi sge, %0, %57 : vector<1x32xi32>
    %c16_i32 = arith.constant 16 : i32
    %59 = vector.broadcast %c16_i32 : i32 to vector<1x32xi32>
    %60 = arith.cmpi slt, %0, %59 : vector<1x32xi32>
    %61 = arith.andi %58, %60 : vector<1x32xi1>
    %cst_39 = arith.constant 1.000000e+00 : f32
    %cst_40 = arith.constant 0.000000e+00 : f32
    %62 = vector.broadcast %cst_39 : f32 to vector<1x32xf32>
    %63 = vector.broadcast %cst_40 : f32 to vector<1x32xf32>
    %64 = arith.select %61, %62, %63 : vector<1x32xi1>, vector<1x32xf32>
    %65 = vector.broadcast %64 : vector<1x32xf32> to vector<8x32xf32>
    %66 = arith.mulf %15, %65 : vector<8x32xf32>
    %cst_41 = arith.constant dense<0.000000e+00> : vector<8x8xf32>
    %67 = tpu.matmul %66, %22, %cst_41 {dimension_numbers = #tpu.dot_dimension_numbers<[1], [1], [0], [0], [0, 0, 1, 0], [], []>} : vector<8x32xf32>, vector<8x32xf32>, vector<8x8xf32> -> vector<8x8xf32>
    %cst_42 = arith.constant 0.353553385 : f32
    %68 = vector.broadcast %cst_42 : f32 to vector<8x8xf32>
    %69 = arith.mulf %67, %68 : vector<8x8xf32>
    %cst_43 = arith.constant dense<0xFF800000> : vector<8xf32>
    %70 = vector.multi_reduction <maximumf>, %69, %cst_43 [1] : vector<8x8xf32> to vector<8xf32>
    %71 = vector.shape_cast %70 : vector<8xf32> to vector<8x1xf32>
    %72 = vector.broadcast %71 : vector<8x1xf32> to vector<8x8xf32>
    %73 = arith.subf %69, %72 : vector<8x8xf32>
    %74 = math.exp %73 : vector<8x8xf32>
    %cst_44 = arith.constant dense<0.000000e+00> : vector<8xf32>
    %75 = vector.multi_reduction <add>, %74, %cst_44 [1] : vector<8x8xf32> to vector<8xf32>
    %76 = vector.shape_cast %75 : vector<8xf32> to vector<8x1xf32>
    %77 = vector.broadcast %76 : vector<8x1xf32> to vector<8x8xf32>
    %78 = arith.divf %74, %77 : vector<8x8xf32>
    %79 = vector.broadcast %64 : vector<1x32xf32> to vector<8x32xf32>
    %80 = arith.mulf %29, %79 : vector<8x32xf32>
    %cst_45 = arith.constant dense<0.000000e+00> : vector<8x32xf32>
    %81 = tpu.matmul %78, %80, %cst_45 {dimension_numbers = #tpu.dot_dimension_numbers<[1], [0], [0], [1], [0, 0, 1, 1], [], []>} : vector<8x8xf32>, vector<8x32xf32>, vector<8x32xf32> -> vector<8x32xf32>
    %82 = arith.addf %56, %81 : vector<8x32xf32>
    %c16_i32_46 = arith.constant 16 : i32
    %83 = vector.broadcast %c16_i32_46 : i32 to vector<1x32xi32>
    %84 = arith.cmpi sge, %0, %83 : vector<1x32xi32>
    %c24_i32 = arith.constant 24 : i32
    %85 = vector.broadcast %c24_i32 : i32 to vector<1x32xi32>
    %86 = arith.cmpi slt, %0, %85 : vector<1x32xi32>
    %87 = arith.andi %84, %86 : vector<1x32xi1>
    %cst_47 = arith.constant 1.000000e+00 : f32
    %cst_48 = arith.constant 0.000000e+00 : f32
    %88 = vector.broadcast %cst_47 : f32 to vector<1x32xf32>
    %89 = vector.broadcast %cst_48 : f32 to vector<1x32xf32>
    %90 = arith.select %87, %88, %89 : vector<1x32xi1>, vector<1x32xf32>
    %91 = vector.broadcast %90 : vector<1x32xf32> to vector<8x32xf32>
    %92 = arith.mulf %15, %91 : vector<8x32xf32>
    %cst_49 = arith.constant dense<0.000000e+00> : vector<8x8xf32>
    %93 = tpu.matmul %92, %22, %cst_49 {dimension_numbers = #tpu.dot_dimension_numbers<[1], [1], [0], [0], [0, 0, 1, 0], [], []>} : vector<8x32xf32>, vector<8x32xf32>, vector<8x8xf32> -> vector<8x8xf32>
    %cst_50 = arith.constant 0.353553385 : f32
    %94 = vector.broadcast %cst_50 : f32 to vector<8x8xf32>
    %95 = arith.mulf %93, %94 : vector<8x8xf32>
    %cst_51 = arith.constant dense<0xFF800000> : vector<8xf32>
    %96 = vector.multi_reduction <maximumf>, %95, %cst_51 [1] : vector<8x8xf32> to vector<8xf32>
    %97 = vector.shape_cast %96 : vector<8xf32> to vector<8x1xf32>
    %98 = vector.broadcast %97 : vector<8x1xf32> to vector<8x8xf32>
    %99 = arith.subf %95, %98 : vector<8x8xf32>
    %100 = math.exp %99 : vector<8x8xf32>
    %cst_52 = arith.constant dense<0.000000e+00> : vector<8xf32>
    %101 = vector.multi_reduction <add>, %100, %cst_52 [1] : vector<8x8xf32> to vector<8xf32>
    %102 = vector.shape_cast %101 : vector<8xf32> to vector<8x1xf32>
    %103 = vector.broadcast %102 : vector<8x1xf32> to vector<8x8xf32>
    %104 = arith.divf %100, %103 : vector<8x8xf32>
    %105 = vector.broadcast %90 : vector<1x32xf32> to vector<8x32xf32>
    %106 = arith.mulf %29, %105 : vector<8x32xf32>
    %cst_53 = arith.constant dense<0.000000e+00> : vector<8x32xf32>
    %107 = tpu.matmul %104, %106, %cst_53 {dimension_numbers = #tpu.dot_dimension_numbers<[1], [0], [0], [1], [0, 0, 1, 1], [], []>} : vector<8x8xf32>, vector<8x32xf32>, vector<8x32xf32> -> vector<8x32xf32>
    %108 = arith.addf %82, %107 : vector<8x32xf32>
    %c24_i32_54 = arith.constant 24 : i32
    %109 = vector.broadcast %c24_i32_54 : i32 to vector<1x32xi32>
    %110 = arith.cmpi sge, %0, %109 : vector<1x32xi32>
    %c32_i32 = arith.constant 32 : i32
    %111 = vector.broadcast %c32_i32 : i32 to vector<1x32xi32>
    %112 = arith.cmpi slt, %0, %111 : vector<1x32xi32>
    %113 = arith.andi %110, %112 : vector<1x32xi1>
    %cst_55 = arith.constant 1.000000e+00 : f32
    %cst_56 = arith.constant 0.000000e+00 : f32
    %114 = vector.broadcast %cst_55 : f32 to vector<1x32xf32>
    %115 = vector.broadcast %cst_56 : f32 to vector<1x32xf32>
    %116 = arith.select %113, %114, %115 : vector<1x32xi1>, vector<1x32xf32>
    %117 = vector.broadcast %116 : vector<1x32xf32> to vector<8x32xf32>
    %118 = arith.mulf %15, %117 : vector<8x32xf32>
    %cst_57 = arith.constant dense<0.000000e+00> : vector<8x8xf32>
    %119 = tpu.matmul %118, %22, %cst_57 {dimension_numbers = #tpu.dot_dimension_numbers<[1], [1], [0], [0], [0, 0, 1, 0], [], []>} : vector<8x32xf32>, vector<8x32xf32>, vector<8x8xf32> -> vector<8x8xf32>
    %cst_58 = arith.constant 0.353553385 : f32
    %120 = vector.broadcast %cst_58 : f32 to vector<8x8xf32>
    %121 = arith.mulf %119, %120 : vector<8x8xf32>
    %cst_59 = arith.constant dense<0xFF800000> : vector<8xf32>
    %122 = vector.multi_reduction <maximumf>, %121, %cst_59 [1] : vector<8x8xf32> to vector<8xf32>
    %123 = vector.shape_cast %122 : vector<8xf32> to vector<8x1xf32>
    %124 = vector.broadcast %123 : vector<8x1xf32> to vector<8x8xf32>
    %125 = arith.subf %121, %124 : vector<8x8xf32>
    %126 = math.exp %125 : vector<8x8xf32>
    %cst_60 = arith.constant dense<0.000000e+00> : vector<8xf32>
    %127 = vector.multi_reduction <add>, %126, %cst_60 [1] : vector<8x8xf32> to vector<8xf32>
    %128 = vector.shape_cast %127 : vector<8xf32> to vector<8x1xf32>
    %129 = vector.broadcast %128 : vector<8x1xf32> to vector<8x8xf32>
    %130 = arith.divf %126, %129 : vector<8x8xf32>
    %131 = vector.broadcast %116 : vector<1x32xf32> to vector<8x32xf32>
    %132 = arith.mulf %29, %131 : vector<8x32xf32>
    %cst_61 = arith.constant dense<0.000000e+00> : vector<8x32xf32>
    %133 = tpu.matmul %130, %132, %cst_61 {dimension_numbers = #tpu.dot_dimension_numbers<[1], [0], [0], [1], [0, 0, 1, 1], [], []>} : vector<8x8xf32>, vector<8x32xf32>, vector<8x32xf32> -> vector<8x32xf32>
    %134 = arith.addf %108, %133 : vector<8x32xf32>
    %cst_62 = arith.constant dense<0.000000e+00> : vector<8x32xf32>
    %135 = tpu.matmul %134, %7, %cst_62 {dimension_numbers = #tpu.dot_dimension_numbers<[1], [0], [0], [1], [0, 0, 1, 1], [], []>} : vector<8x32xf32>, vector<32x32xf32>, vector<8x32xf32> -> vector<8x32xf32>
    %136 = vector.broadcast %8 : vector<1x32xf32> to vector<8x32xf32>
    %137 = arith.addf %135, %136 : vector<8x32xf32>
    %138 = arith.addf %2, %137 : vector<8x32xf32>
    %c0_63 = arith.constant 0 : index
    %c0_64 = arith.constant 0 : index
    %139 = vector.load %arg8[%c0_63, %c0_64] : memref<1x32xf32, #tpu.memory_space<vmem>>, vector<1x32xf32>
    %c0_65 = arith.constant 0 : index
    %c0_66 = arith.constant 0 : index
    %140 = vector.load %arg9[%c0_65, %c0_66] : memref<1x32xf32, #tpu.memory_space<vmem>>, vector<1x32xf32>
    %cst_67 = arith.constant dense<0.000000e+00> : vector<8xf32>
    %141 = vector.multi_reduction <add>, %138, %cst_67 [1] : vector<8x32xf32> to vector<8xf32>
    %142 = vector.shape_cast %141 : vector<8xf32> to vector<8x1xf32>
    %cst_68 = arith.constant 3.200000e+01 : f32
    %143 = vector.broadcast %cst_68 : f32 to vector<8x1xf32>
    %144 = arith.divf %142, %143 : vector<8x1xf32>
    %145 = vector.broadcast %144 : vector<8x1xf32> to vector<8x32xf32>
    %146 = arith.subf %138, %145 : vector<8x32xf32>
    %147 = arith.mulf %146, %146 : vector<8x32xf32>
    %cst_69 = arith.constant dense<0.000000e+00> : vector<8xf32>
    %148 = vector.multi_reduction <add>, %147, %cst_69 [1] : vector<8x32xf32> to vector<8xf32>
    %149 = vector.shape_cast %148 : vector<8xf32> to vector<8x1xf32>
    %cst_70 = arith.constant 3.200000e+01 : f32
    %150 = vector.broadcast %cst_70 : f32 to vector<8x1xf32>
    %151 = arith.divf %149, %150 : vector<8x1xf32>
    %cst_71 = arith.constant 9.99999974E-6 : f32
    %152 = vector.broadcast %cst_71 : f32 to vector<8x1xf32>
    %153 = arith.addf %151, %152 : vector<8x1xf32>
    %154 = math.rsqrt %153 : vector<8x1xf32>
    %155 = vector.broadcast %154 : vector<8x1xf32> to vector<8x32xf32>
    %156 = arith.mulf %146, %155 : vector<8x32xf32>
    %157 = vector.broadcast %139 : vector<1x32xf32> to vector<8x32xf32>
    %158 = arith.mulf %156, %157 : vector<8x32xf32>
    %159 = vector.broadcast %140 : vector<1x32xf32> to vector<8x32xf32>
    %160 = arith.addf %158, %159 : vector<8x32xf32>
    %c0_72 = arith.constant 0 : index
    %c0_73 = arith.constant 0 : index
    %161 = vector.load %arg12[%c0_72, %c0_73] : memref<32x32xf32, #tpu.memory_space<vmem>>, vector<32x32xf32>
    %c0_74 = arith.constant 0 : index
    %c0_75 = arith.constant 0 : index
    %162 = vector.load %arg13[%c0_74, %c0_75] : memref<1x32xf32, #tpu.memory_space<vmem>>, vector<1x32xf32>
    %c0_76 = arith.constant 0 : index
    %c0_77 = arith.constant 0 : index
    %c0_78 = arith.constant 0 : index
    %163 = vector.load %arg10[%c0_76, %c0_77, %c0_78] : memref<3x32x32xf32, #tpu.memory_space<vmem>>, vector<1x32x32xf32>
    %164 = vector.shape_cast %163 : vector<1x32x32xf32> to vector<32x32xf32>
    %cst_79 = arith.constant dense<0.000000e+00> : vector<8x32xf32>
    %165 = tpu.matmul %160, %164, %cst_79 {dimension_numbers = #tpu.dot_dimension_numbers<[1], [0], [0], [1], [0, 0, 1, 1], [], []>} : vector<8x32xf32>, vector<32x32xf32>, vector<8x32xf32> -> vector<8x32xf32>
    %c0_80 = arith.constant 0 : index
    %c0_81 = arith.constant 0 : index
    %c0_82 = arith.constant 0 : index
    %166 = vector.load %arg11[%c0_80, %c0_81, %c0_82] : memref<3x1x32xf32, #tpu.memory_space<vmem>>, vector<1x1x32xf32>
    %167 = vector.shape_cast %166 : vector<1x1x32xf32> to vector<1x32xf32>
    %168 = vector.broadcast %167 : vector<1x32xf32> to vector<8x32xf32>
    %169 = arith.addf %165, %168 : vector<8x32xf32>
    %c1_83 = arith.constant 1 : index
    %c0_84 = arith.constant 0 : index
    %c0_85 = arith.constant 0 : index
    %170 = vector.load %arg10[%c1_83, %c0_84, %c0_85] : memref<3x32x32xf32, #tpu.memory_space<vmem>>, vector<1x32x32xf32>
    %171 = vector.shape_cast %170 : vector<1x32x32xf32> to vector<32x32xf32>
    %cst_86 = arith.constant dense<0.000000e+00> : vector<8x32xf32>
    %172 = tpu.matmul %160, %171, %cst_86 {dimension_numbers = #tpu.dot_dimension_numbers<[1], [0], [0], [1], [0, 0, 1, 1], [], []>} : vector<8x32xf32>, vector<32x32xf32>, vector<8x32xf32> -> vector<8x32xf32>
    %c1_87 = arith.constant 1 : index
    %c0_88 = arith.constant 0 : index
    %c0_89 = arith.constant 0 : index
    %173 = vector.load %arg11[%c1_87, %c0_88, %c0_89] : memref<3x1x32xf32, #tpu.memory_space<vmem>>, vector<1x1x32xf32>
    %174 = vector.shape_cast %173 : vector<1x1x32xf32> to vector<1x32xf32>
    %175 = vector.broadcast %174 : vector<1x32xf32> to vector<8x32xf32>
    %176 = arith.addf %172, %175 : vector<8x32xf32>
    %c2_90 = arith.constant 2 : index
    %c0_91 = arith.constant 0 : index
    %c0_92 = arith.constant 0 : index
    %177 = vector.load %arg10[%c2_90, %c0_91, %c0_92] : memref<3x32x32xf32, #tpu.memory_space<vmem>>, vector<1x32x32xf32>
    %178 = vector.shape_cast %177 : vector<1x32x32xf32> to vector<32x32xf32>
    %cst_93 = arith.constant dense<0.000000e+00> : vector<8x32xf32>
    %179 = tpu.matmul %160, %178, %cst_93 {dimension_numbers = #tpu.dot_dimension_numbers<[1], [0], [0], [1], [0, 0, 1, 1], [], []>} : vector<8x32xf32>, vector<32x32xf32>, vector<8x32xf32> -> vector<8x32xf32>
    %c2_94 = arith.constant 2 : index
    %c0_95 = arith.constant 0 : index
    %c0_96 = arith.constant 0 : index
    %180 = vector.load %arg11[%c2_94, %c0_95, %c0_96] : memref<3x1x32xf32, #tpu.memory_space<vmem>>, vector<1x1x32xf32>
    %181 = vector.shape_cast %180 : vector<1x1x32xf32> to vector<1x32xf32>
    %182 = vector.broadcast %181 : vector<1x32xf32> to vector<8x32xf32>
    %183 = arith.addf %179, %182 : vector<8x32xf32>
    %cst_97 = arith.constant 0.000000e+00 : f32
    %184 = vector.broadcast %cst_97 : f32 to vector<8x32xf32>
    %c0_i32_98 = arith.constant 0 : i32
    %185 = vector.broadcast %c0_i32_98 : i32 to vector<1x32xi32>
    %186 = arith.cmpi sge, %0, %185 : vector<1x32xi32>
    %c8_i32_99 = arith.constant 8 : i32
    %187 = vector.broadcast %c8_i32_99 : i32 to vector<1x32xi32>
    %188 = arith.cmpi slt, %0, %187 : vector<1x32xi32>
    %189 = arith.andi %186, %188 : vector<1x32xi1>
    %cst_100 = arith.constant 1.000000e+00 : f32
    %cst_101 = arith.constant 0.000000e+00 : f32
    %190 = vector.broadcast %cst_100 : f32 to vector<1x32xf32>
    %191 = vector.broadcast %cst_101 : f32 to vector<1x32xf32>
    %192 = arith.select %189, %190, %191 : vector<1x32xi1>, vector<1x32xf32>
    %193 = vector.broadcast %192 : vector<1x32xf32> to vector<8x32xf32>
    %194 = arith.mulf %169, %193 : vector<8x32xf32>
    %cst_102 = arith.constant dense<0.000000e+00> : vector<8x8xf32>
    %195 = tpu.matmul %194, %176, %cst_102 {dimension_numbers = #tpu.dot_dimension_numbers<[1], [1], [0], [0], [0, 0, 1, 0], [], []>} : vector<8x32xf32>, vector<8x32xf32>, vector<8x8xf32> -> vector<8x8xf32>
    %cst_103 = arith.constant 0.353553385 : f32
    %196 = vector.broadcast %cst_103 : f32 to vector<8x8xf32>
    %197 = arith.mulf %195, %196 : vector<8x8xf32>
    %cst_104 = arith.constant dense<0xFF800000> : vector<8xf32>
    %198 = vector.multi_reduction <maximumf>, %197, %cst_104 [1] : vector<8x8xf32> to vector<8xf32>
    %199 = vector.shape_cast %198 : vector<8xf32> to vector<8x1xf32>
    %200 = vector.broadcast %199 : vector<8x1xf32> to vector<8x8xf32>
    %201 = arith.subf %197, %200 : vector<8x8xf32>
    %202 = math.exp %201 : vector<8x8xf32>
    %cst_105 = arith.constant dense<0.000000e+00> : vector<8xf32>
    %203 = vector.multi_reduction <add>, %202, %cst_105 [1] : vector<8x8xf32> to vector<8xf32>
    %204 = vector.shape_cast %203 : vector<8xf32> to vector<8x1xf32>
    %205 = vector.broadcast %204 : vector<8x1xf32> to vector<8x8xf32>
    %206 = arith.divf %202, %205 : vector<8x8xf32>
    %207 = vector.broadcast %192 : vector<1x32xf32> to vector<8x32xf32>
    %208 = arith.mulf %183, %207 : vector<8x32xf32>
    %cst_106 = arith.constant dense<0.000000e+00> : vector<8x32xf32>
    %209 = tpu.matmul %206, %208, %cst_106 {dimension_numbers = #tpu.dot_dimension_numbers<[1], [0], [0], [1], [0, 0, 1, 1], [], []>} : vector<8x8xf32>, vector<8x32xf32>, vector<8x32xf32> -> vector<8x32xf32>
    %210 = arith.addf %184, %209 : vector<8x32xf32>
    %c8_i32_107 = arith.constant 8 : i32
    %211 = vector.broadcast %c8_i32_107 : i32 to vector<1x32xi32>
    %212 = arith.cmpi sge, %0, %211 : vector<1x32xi32>
    %c16_i32_108 = arith.constant 16 : i32
    %213 = vector.broadcast %c16_i32_108 : i32 to vector<1x32xi32>
    %214 = arith.cmpi slt, %0, %213 : vector<1x32xi32>
    %215 = arith.andi %212, %214 : vector<1x32xi1>
    %cst_109 = arith.constant 1.000000e+00 : f32
    %cst_110 = arith.constant 0.000000e+00 : f32
    %216 = vector.broadcast %cst_109 : f32 to vector<1x32xf32>
    %217 = vector.broadcast %cst_110 : f32 to vector<1x32xf32>
    %218 = arith.select %215, %216, %217 : vector<1x32xi1>, vector<1x32xf32>
    %219 = vector.broadcast %218 : vector<1x32xf32> to vector<8x32xf32>
    %220 = arith.mulf %169, %219 : vector<8x32xf32>
    %cst_111 = arith.constant dense<0.000000e+00> : vector<8x8xf32>
    %221 = tpu.matmul %220, %176, %cst_111 {dimension_numbers = #tpu.dot_dimension_numbers<[1], [1], [0], [0], [0, 0, 1, 0], [], []>} : vector<8x32xf32>, vector<8x32xf32>, vector<8x8xf32> -> vector<8x8xf32>
    %cst_112 = arith.constant 0.353553385 : f32
    %222 = vector.broadcast %cst_112 : f32 to vector<8x8xf32>
    %223 = arith.mulf %221, %222 : vector<8x8xf32>
    %cst_113 = arith.constant dense<0xFF800000> : vector<8xf32>
    %224 = vector.multi_reduction <maximumf>, %223, %cst_113 [1] : vector<8x8xf32> to vector<8xf32>
    %225 = vector.shape_cast %224 : vector<8xf32> to vector<8x1xf32>
    %226 = vector.broadcast %225 : vector<8x1xf32> to vector<8x8xf32>
    %227 = arith.subf %223, %226 : vector<8x8xf32>
    %228 = math.exp %227 : vector<8x8xf32>
    %cst_114 = arith.constant dense<0.000000e+00> : vector<8xf32>
    %229 = vector.multi_reduction <add>, %228, %cst_114 [1] : vector<8x8xf32> to vector<8xf32>
    %230 = vector.shape_cast %229 : vector<8xf32> to vector<8x1xf32>
    %231 = vector.broadcast %230 : vector<8x1xf32> to vector<8x8xf32>
    %232 = arith.divf %228, %231 : vector<8x8xf32>
    %233 = vector.broadcast %218 : vector<1x32xf32> to vector<8x32xf32>
    %234 = arith.mulf %183, %233 : vector<8x32xf32>
    %cst_115 = arith.constant dense<0.000000e+00> : vector<8x32xf32>
    %235 = tpu.matmul %232, %234, %cst_115 {dimension_numbers = #tpu.dot_dimension_numbers<[1], [0], [0], [1], [0, 0, 1, 1], [], []>} : vector<8x8xf32>, vector<8x32xf32>, vector<8x32xf32> -> vector<8x32xf32>
    %236 = arith.addf %210, %235 : vector<8x32xf32>
    %c16_i32_116 = arith.constant 16 : i32
    %237 = vector.broadcast %c16_i32_116 : i32 to vector<1x32xi32>
    %238 = arith.cmpi sge, %0, %237 : vector<1x32xi32>
    %c24_i32_117 = arith.constant 24 : i32
    %239 = vector.broadcast %c24_i32_117 : i32 to vector<1x32xi32>
    %240 = arith.cmpi slt, %0, %239 : vector<1x32xi32>
    %241 = arith.andi %238, %240 : vector<1x32xi1>
    %cst_118 = arith.constant 1.000000e+00 : f32
    %cst_119 = arith.constant 0.000000e+00 : f32
    %242 = vector.broadcast %cst_118 : f32 to vector<1x32xf32>
    %243 = vector.broadcast %cst_119 : f32 to vector<1x32xf32>
    %244 = arith.select %241, %242, %243 : vector<1x32xi1>, vector<1x32xf32>
    %245 = vector.broadcast %244 : vector<1x32xf32> to vector<8x32xf32>
    %246 = arith.mulf %169, %245 : vector<8x32xf32>
    %cst_120 = arith.constant dense<0.000000e+00> : vector<8x8xf32>
    %247 = tpu.matmul %246, %176, %cst_120 {dimension_numbers = #tpu.dot_dimension_numbers<[1], [1], [0], [0], [0, 0, 1, 0], [], []>} : vector<8x32xf32>, vector<8x32xf32>, vector<8x8xf32> -> vector<8x8xf32>
    %cst_121 = arith.constant 0.353553385 : f32
    %248 = vector.broadcast %cst_121 : f32 to vector<8x8xf32>
    %249 = arith.mulf %247, %248 : vector<8x8xf32>
    %cst_122 = arith.constant dense<0xFF800000> : vector<8xf32>
    %250 = vector.multi_reduction <maximumf>, %249, %cst_122 [1] : vector<8x8xf32> to vector<8xf32>
    %251 = vector.shape_cast %250 : vector<8xf32> to vector<8x1xf32>
    %252 = vector.broadcast %251 : vector<8x1xf32> to vector<8x8xf32>
    %253 = arith.subf %249, %252 : vector<8x8xf32>
    %254 = math.exp %253 : vector<8x8xf32>
    %cst_123 = arith.constant dense<0.000000e+00> : vector<8xf32>
    %255 = vector.multi_reduction <add>, %254, %cst_123 [1] : vector<8x8xf32> to vector<8xf32>
    %256 = vector.shape_cast %255 : vector<8xf32> to vector<8x1xf32>
    %257 = vector.broadcast %256 : vector<8x1xf32> to vector<8x8xf32>
    %258 = arith.divf %254, %257 : vector<8x8xf32>
    %259 = vector.broadcast %244 : vector<1x32xf32> to vector<8x32xf32>
    %260 = arith.mulf %183, %259 : vector<8x32xf32>
    %cst_124 = arith.constant dense<0.000000e+00> : vector<8x32xf32>
    %261 = tpu.matmul %258, %260, %cst_124 {dimension_numbers = #tpu.dot_dimension_numbers<[1], [0], [0], [1], [0, 0, 1, 1], [], []>} : vector<8x8xf32>, vector<8x32xf32>, vector<8x32xf32> -> vector<8x32xf32>
    %262 = arith.addf %236, %261 : vector<8x32xf32>
    %c24_i32_125 = arith.constant 24 : i32
    %263 = vector.broadcast %c24_i32_125 : i32 to vector<1x32xi32>
    %264 = arith.cmpi sge, %0, %263 : vector<1x32xi32>
    %c32_i32_126 = arith.constant 32 : i32
    %265 = vector.broadcast %c32_i32_126 : i32 to vector<1x32xi32>
    %266 = arith.cmpi slt, %0, %265 : vector<1x32xi32>
    %267 = arith.andi %264, %266 : vector<1x32xi1>
    %cst_127 = arith.constant 1.000000e+00 : f32
    %cst_128 = arith.constant 0.000000e+00 : f32
    %268 = vector.broadcast %cst_127 : f32 to vector<1x32xf32>
    %269 = vector.broadcast %cst_128 : f32 to vector<1x32xf32>
    %270 = arith.select %267, %268, %269 : vector<1x32xi1>, vector<1x32xf32>
    %271 = vector.broadcast %270 : vector<1x32xf32> to vector<8x32xf32>
    %272 = arith.mulf %169, %271 : vector<8x32xf32>
    %cst_129 = arith.constant dense<0.000000e+00> : vector<8x8xf32>
    %273 = tpu.matmul %272, %176, %cst_129 {dimension_numbers = #tpu.dot_dimension_numbers<[1], [1], [0], [0], [0, 0, 1, 0], [], []>} : vector<8x32xf32>, vector<8x32xf32>, vector<8x8xf32> -> vector<8x8xf32>
    %cst_130 = arith.constant 0.353553385 : f32
    %274 = vector.broadcast %cst_130 : f32 to vector<8x8xf32>
    %275 = arith.mulf %273, %274 : vector<8x8xf32>
    %cst_131 = arith.constant dense<0xFF800000> : vector<8xf32>
    %276 = vector.multi_reduction <maximumf>, %275, %cst_131 [1] : vector<8x8xf32> to vector<8xf32>
    %277 = vector.shape_cast %276 : vector<8xf32> to vector<8x1xf32>
    %278 = vector.broadcast %277 : vector<8x1xf32> to vector<8x8xf32>
    %279 = arith.subf %275, %278 : vector<8x8xf32>
    %280 = math.exp %279 : vector<8x8xf32>
    %cst_132 = arith.constant dense<0.000000e+00> : vector<8xf32>
    %281 = vector.multi_reduction <add>, %280, %cst_132 [1] : vector<8x8xf32> to vector<8xf32>
    %282 = vector.shape_cast %281 : vector<8xf32> to vector<8x1xf32>
    %283 = vector.broadcast %282 : vector<8x1xf32> to vector<8x8xf32>
    %284 = arith.divf %280, %283 : vector<8x8xf32>
    %285 = vector.broadcast %270 : vector<1x32xf32> to vector<8x32xf32>
    %286 = arith.mulf %183, %285 : vector<8x32xf32>
    %cst_133 = arith.constant dense<0.000000e+00> : vector<8x32xf32>
    %287 = tpu.matmul %284, %286, %cst_133 {dimension_numbers = #tpu.dot_dimension_numbers<[1], [0], [0], [1], [0, 0, 1, 1], [], []>} : vector<8x8xf32>, vector<8x32xf32>, vector<8x32xf32> -> vector<8x32xf32>
    %288 = arith.addf %262, %287 : vector<8x32xf32>
    %cst_134 = arith.constant dense<0.000000e+00> : vector<8x32xf32>
    %289 = tpu.matmul %288, %161, %cst_134 {dimension_numbers = #tpu.dot_dimension_numbers<[1], [0], [0], [1], [0, 0, 1, 1], [], []>} : vector<8x32xf32>, vector<32x32xf32>, vector<8x32xf32> -> vector<8x32xf32>
    %290 = vector.broadcast %162 : vector<1x32xf32> to vector<8x32xf32>
    %291 = arith.addf %289, %290 : vector<8x32xf32>
    %292 = arith.addf %160, %291 : vector<8x32xf32>
    %c0_135 = arith.constant 0 : index
    %c0_136 = arith.constant 0 : index
    %293 = vector.load %arg14[%c0_135, %c0_136] : memref<1x32xf32, #tpu.memory_space<vmem>>, vector<1x32xf32>
    %c0_137 = arith.constant 0 : index
    %c0_138 = arith.constant 0 : index
    %294 = vector.load %arg15[%c0_137, %c0_138] : memref<1x32xf32, #tpu.memory_space<vmem>>, vector<1x32xf32>
    %cst_139 = arith.constant dense<0.000000e+00> : vector<8xf32>
    %295 = vector.multi_reduction <add>, %292, %cst_139 [1] : vector<8x32xf32> to vector<8xf32>
    %296 = vector.shape_cast %295 : vector<8xf32> to vector<8x1xf32>
    %cst_140 = arith.constant 3.200000e+01 : f32
    %297 = vector.broadcast %cst_140 : f32 to vector<8x1xf32>
    %298 = arith.divf %296, %297 : vector<8x1xf32>
    %299 = vector.broadcast %298 : vector<8x1xf32> to vector<8x32xf32>
    %300 = arith.subf %292, %299 : vector<8x32xf32>
    %301 = arith.mulf %300, %300 : vector<8x32xf32>
    %cst_141 = arith.constant dense<0.000000e+00> : vector<8xf32>
    %302 = vector.multi_reduction <add>, %301, %cst_141 [1] : vector<8x32xf32> to vector<8xf32>
    %303 = vector.shape_cast %302 : vector<8xf32> to vector<8x1xf32>
    %cst_142 = arith.constant 3.200000e+01 : f32
    %304 = vector.broadcast %cst_142 : f32 to vector<8x1xf32>
    %305 = arith.divf %303, %304 : vector<8x1xf32>
    %cst_143 = arith.constant 9.99999974E-6 : f32
    %306 = vector.broadcast %cst_143 : f32 to vector<8x1xf32>
    %307 = arith.addf %305, %306 : vector<8x1xf32>
    %308 = math.rsqrt %307 : vector<8x1xf32>
    %309 = vector.broadcast %308 : vector<8x1xf32> to vector<8x32xf32>
    %310 = arith.mulf %300, %309 : vector<8x32xf32>
    %311 = vector.broadcast %293 : vector<1x32xf32> to vector<8x32xf32>
    %312 = arith.mulf %310, %311 : vector<8x32xf32>
    %313 = vector.broadcast %294 : vector<1x32xf32> to vector<8x32xf32>
    %314 = arith.addf %312, %313 : vector<8x32xf32>
    %c0_144 = arith.constant 0 : index
    %c0_145 = arith.constant 0 : index
    %315 = vector.load %arg16[%c0_144, %c0_145] : memref<32x64xf32, #tpu.memory_space<vmem>>, vector<32x64xf32>
    %cst_146 = arith.constant dense<0.000000e+00> : vector<8x64xf32>
    %316 = tpu.matmul %314, %315, %cst_146 {dimension_numbers = #tpu.dot_dimension_numbers<[1], [0], [0], [1], [0, 0, 1, 1], [], []>} : vector<8x32xf32>, vector<32x64xf32>, vector<8x64xf32> -> vector<8x64xf32>
    %c0_147 = arith.constant 0 : index
    %c0_148 = arith.constant 0 : index
    %317 = vector.load %arg17[%c0_147, %c0_148] : memref<1x64xf32, #tpu.memory_space<vmem>>, vector<1x64xf32>
    %318 = vector.broadcast %317 : vector<1x64xf32> to vector<8x64xf32>
    %319 = arith.addf %316, %318 : vector<8x64xf32>
    %cst_149 = arith.constant 0.000000e+00 : f32
    %320 = vector.broadcast %cst_149 : f32 to vector<8x64xf32>
    %321 = arith.maximumf %319, %320 : vector<8x64xf32>
    %c0_150 = arith.constant 0 : index
    %c0_151 = arith.constant 0 : index
    %322 = vector.load %arg18[%c0_150, %c0_151] : memref<64x32xf32, #tpu.memory_space<vmem>>, vector<64x32xf32>
    %cst_152 = arith.constant dense<0.000000e+00> : vector<8x32xf32>
    %323 = tpu.matmul %321, %322, %cst_152 {dimension_numbers = #tpu.dot_dimension_numbers<[1], [0], [0], [1], [0, 0, 1, 1], [], []>} : vector<8x64xf32>, vector<64x32xf32>, vector<8x32xf32> -> vector<8x32xf32>
    %c0_153 = arith.constant 0 : index
    %c0_154 = arith.constant 0 : index
    %324 = vector.load %arg19[%c0_153, %c0_154] : memref<1x32xf32, #tpu.memory_space<vmem>>, vector<1x32xf32>
    %325 = vector.broadcast %324 : vector<1x32xf32> to vector<8x32xf32>
    %326 = arith.addf %323, %325 : vector<8x32xf32>
    %327 = arith.addf %314, %326 : vector<8x32xf32>
    %c0_155 = arith.constant 0 : index
    %c0_156 = arith.constant 0 : index
    %328 = vector.load %arg20[%c0_155, %c0_156] : memref<1x32xf32, #tpu.memory_space<vmem>>, vector<1x32xf32>
    %c0_157 = arith.constant 0 : index
    %c0_158 = arith.constant 0 : index
    %329 = vector.load %arg21[%c0_157, %c0_158] : memref<1x32xf32, #tpu.memory_space<vmem>>, vector<1x32xf32>
    %cst_159 = arith.constant dense<0.000000e+00> : vector<8xf32>
    %330 = vector.multi_reduction <add>, %327, %cst_159 [1] : vector<8x32xf32> to vector<8xf32>
    %331 = vector.shape_cast %330 : vector<8xf32> to vector<8x1xf32>
    %cst_160 = arith.constant 3.200000e+01 : f32
    %332 = vector.broadcast %cst_160 : f32 to vector<8x1xf32>
    %333 = arith.divf %331, %332 : vector<8x1xf32>
    %334 = vector.broadcast %333 : vector<8x1xf32> to vector<8x32xf32>
    %335 = arith.subf %327, %334 : vector<8x32xf32>
    %336 = arith.mulf %335, %335 : vector<8x32xf32>
    %cst_161 = arith.constant dense<0.000000e+00> : vector<8xf32>
    %337 = vector.multi_reduction <add>, %336, %cst_161 [1] : vector<8x32xf32> to vector<8xf32>
    %338 = vector.shape_cast %337 : vector<8xf32> to vector<8x1xf32>
    %cst_162 = arith.constant 3.200000e+01 : f32
    %339 = vector.broadcast %cst_162 : f32 to vector<8x1xf32>
    %340 = arith.divf %338, %339 : vector<8x1xf32>
    %cst_163 = arith.constant 9.99999974E-6 : f32
    %341 = vector.broadcast %cst_163 : f32 to vector<8x1xf32>
    %342 = arith.addf %340, %341 : vector<8x1xf32>
    %343 = math.rsqrt %342 : vector<8x1xf32>
    %344 = vector.broadcast %343 : vector<8x1xf32> to vector<8x32xf32>
    %345 = arith.mulf %335, %344 : vector<8x32xf32>
    %346 = vector.broadcast %328 : vector<1x32xf32> to vector<8x32xf32>
    %347 = arith.mulf %345, %346 : vector<8x32xf32>
    %348 = vector.broadcast %329 : vector<1x32xf32> to vector<8x32xf32>
    %349 = arith.addf %347, %348 : vector<8x32xf32>
    %c0_164 = arith.constant 0 : index
    %c0_165 = arith.constant 0 : index
    %c0_166 = arith.constant 0 : index
    %350 = vector.load %arg22[%c0_164, %c0_165, %c0_166] : memref<1x8x32xf32, #tpu.memory_space<vmem>>, vector<1x8x32xf32>
    %351 = vector.shape_cast %350 : vector<1x8x32xf32> to vector<8x32xf32>
    %352 = vector.shape_cast %349 : vector<8x32xf32> to vector<1x8x32xf32>
    tpu.vector_store %arg22[%c0_164, %c0_165, %c0_166], %352 {strides = array<i32>} : memref<1x8x32xf32, #tpu.memory_space<vmem>>, vector<1x8x32xf32>,
    return
  }
  func.func @transform_0(%arg0: i32) -> (i32, i32, i32) {
    %c0_i32 = arith.constant 0 : i32
    %c0_i32_0 = arith.constant 0 : i32
    %c0_i32_1 = arith.constant 0 : i32
    return %arg0, %c0_i32, %c0_i32_0 : i32, i32, i32
  }
  func.func @transform_1(%arg0: i32) -> (i32, i32, i32) {
    %c0_i32 = arith.constant 0 : i32
    %c0_i32_0 = arith.constant 0 : i32
    %c0_i32_1 = arith.constant 0 : i32
    return %arg0, %c0_i32, %c0_i32_0 : i32, i32, i32
  }
  func.func @transform_2(%arg0: i32) -> (i32, i32, i32) {
    %c0_i32 = arith.constant 0 : i32
    %c0_i32_0 = arith.constant 0 : i32
    %c0_i32_1 = arith.constant 0 : i32
    return %arg0, %c0_i32, %c0_i32_0 : i32, i32, i32
  }
  func.func @transform_3(%arg0: i32) -> (i32, i32, i32) {
    %c0_i32 = arith.constant 0 : i32
    %c0_i32_0 = arith.constant 0 : i32
    %c0_i32_1 = arith.constant 0 : i32
    %c0_i32_2 = arith.constant 0 : i32
    return %c0_i32, %c0_i32_0, %c0_i32_1 : i32, i32, i32
  }
  func.func @transform_4(%arg0: i32) -> (i32, i32, i32) {
    %c0_i32 = arith.constant 0 : i32
    %c0_i32_0 = arith.constant 0 : i32
    %c0_i32_1 = arith.constant 0 : i32
    %c0_i32_2 = arith.constant 0 : i32
    return %c0_i32, %c0_i32_0, %c0_i32_1 : i32, i32, i32
  }
  func.func @transform_5(%arg0: i32) -> (i32, i32) {
    %c0_i32 = arith.constant 0 : i32
    %c0_i32_0 = arith.constant 0 : i32
    %c0_i32_1 = arith.constant 0 : i32
    return %c0_i32, %c0_i32_0 : i32, i32
  }
  func.func @transform_6(%arg0: i32) -> (i32, i32) {
    %c0_i32 = arith.constant 0 : i32
    %c0_i32_0 = arith.constant 0 : i32
    %c0_i32_1 = arith.constant 0 : i32
    return %c0_i32, %c0_i32_0 : i32, i32
  }
  func.func @transform_7(%arg0: i32) -> (i32, i32) {
    %c0_i32 = arith.constant 0 : i32
    %c0_i32_0 = arith.constant 0 : i32
    %c0_i32_1 = arith.constant 0 : i32
    return %c0_i32, %c0_i32_0 : i32, i32
  }
  func.func @transform_8(%arg0: i32) -> (i32, i32) {
    %c0_i32 = arith.constant 0 : i32
    %c0_i32_0 = arith.constant 0 : i32
    %c0_i32_1 = arith.constant 0 : i32
    return %c0_i32, %c0_i32_0 : i32, i32
  }
  func.func @transform_9(%arg0: i32) -> (i32, i32, i32) {
    %c0_i32 = arith.constant 0 : i32
    %c0_i32_0 = arith.constant 0 : i32
    %c0_i32_1 = arith.constant 0 : i32
    %c0_i32_2 = arith.constant 0 : i32
    return %c0_i32, %c0_i32_0, %c0_i32_1 : i32, i32, i32
  }
  func.func @transform_10(%arg0: i32) -> (i32, i32, i32) {
    %c0_i32 = arith.constant 0 : i32
    %c0_i32_0 = arith.constant 0 : i32
    %c0_i32_1 = arith.constant 0 : i32
    %c0_i32_2 = arith.constant 0 : i32
    return %c0_i32, %c0_i32_0, %c0_i32_1 : i32, i32, i32
  }
  func.func @transform_11(%arg0: i32) -> (i32, i32) {
    %c0_i32 = arith.constant 0 : i32
    %c0_i32_0 = arith.constant 0 : i32
    %c0_i32_1 = arith.constant 0 : i32
    return %c0_i32, %c0_i32_0 : i32, i32
  }
  func.func @transform_12(%arg0: i32) -> (i32, i32) {
    %c0_i32 = arith.constant 0 : i32
    %c0_i32_0 = arith.constant 0 : i32
    %c0_i32_1 = arith.constant 0 : i32
    return %c0_i32, %c0_i32_0 : i32, i32
  }
  func.func @transform_13(%arg0: i32) -> (i32, i32) {
    %c0_i32 = arith.constant 0 : i32
    %c0_i32_0 = arith.constant 0 : i32
    %c0_i32_1 = arith.constant 0 : i32
    return %c0_i32, %c0_i32_0 : i32, i32
  }
  func.func @transform_14(%arg0: i32) -> (i32, i32) {
    %c0_i32 = arith.constant 0 : i32
    %c0_i32_0 = arith.constant 0 : i32
    %c0_i32_1 = arith.constant 0 : i32
    return %c0_i32, %c0_i32_0 : i32, i32
  }
  func.func @transform_15(%arg0: i32) -> (i32, i32) {
    %c0_i32 = arith.constant 0 : i32
    %c0_i32_0 = arith.constant 0 : i32
    %c0_i32_1 = arith.constant 0 : i32
    return %c0_i32, %c0_i32_0 : i32, i32
  }
  func.func @transform_16(%arg0: i32) -> (i32, i32) {
    %c0_i32 = arith.constant 0 : i32
    %c0_i32_0 = arith.constant 0 : i32
    %c0_i32_1 = arith.constant 0 : i32
    return %c0_i32, %c0_i32_0 : i32, i32
  }
  func.func @transform_17(%arg0: i32) -> (i32, i32) {
    %c0_i32 = arith.constant 0 : i32
    %c0_i32_0 = arith.constant 0 : i32
    %c0_i32_1 = arith.constant 0 : i32
    return %c0_i32, %c0_i32_0 : i32, i32
  }
  func.func @transform_18(%arg0: i32) -> (i32, i32) {
    %c0_i32 = arith.constant 0 : i32
    %c0_i32_0 = arith.constant 0 : i32
    %c0_i32_1 = arith.constant 0 : i32
    return %c0_i32, %c0_i32_0 : i32, i32
  }
  func.func @transform_19(%arg0: i32) -> (i32, i32) {
    %c0_i32 = arith.constant 0 : i32
    %c0_i32_0 = arith.constant 0 : i32
    %c0_i32_1 = arith.constant 0 : i32
    return %c0_i32, %c0_i32_0 : i32, i32
  }
  func.func @transform_20(%arg0: i32) -> (i32, i32) {
    %c0_i32 = arith.constant 0 : i32
    %c0_i32_0 = arith.constant 0 : i32
    %c0_i32_1 = arith.constant 0 : i32
    return %c0_i32, %c0_i32_0 : i32, i32
  }
  func.func @transform_21(%arg0: i32) -> (i32, i32, i32) {
    %c0_i32 = arith.constant 0 : i32
    %c0_i32_0 = arith.constant 0 : i32
    %c0_i32_1 = arith.constant 0 : i32
    return %arg0, %c0_i32, %c0_i32_0 : i32, i32, i32
  }
}

module attributes {stable_mosaic.version = 11 : i64} {
  func.func @_pred_head_kernel(%arg0: i32, %arg1: memref<32x32xf32, #tpu.memory_space<vmem>>, %arg2: memref<1x32xf32, #tpu.memory_space<vmem>>, %arg3: memref<1x32xf32, #tpu.memory_space<vmem>>, %arg4: memref<32x6xf32, #tpu.memory_space<vmem>>, %arg5: memref<1x6xf32, #tpu.memory_space<vmem>>, %arg6: memref<32x32xf32, #tpu.memory_space<vmem>>, %arg7: memref<1x32xf32, #tpu.memory_space<vmem>>, %arg8: memref<32x32xf32, #tpu.memory_space<vmem>>, %arg9: memref<1x32xf32, #tpu.memory_space<vmem>>, %arg10: memref<32x32xf32, #tpu.memory_space<vmem>>, %arg11: memref<1x32xf32, #tpu.memory_space<vmem>>, %arg12: memref<32x6xf32, #tpu.memory_space<vmem>>, %arg13: memref<32x32xf32, #tpu.memory_space<vmem>>) attributes {dimension_semantics = [#tpu.dimension_semantics<parallel>], iteration_bounds = array<i64: 1>, scalar_prefetch = 0 : i64, scratch_operands = 0 : i64, tpu.core_type = #tpu.core_type<tc>, window_params = [{transform_indices = @transform_0, window_bounds = array<i64: 32, 32>}, {pipeline_mode = #tpu.pipeline_mode<synchronous>, transform_indices = @transform_1, window_bounds = array<i64: 1, 32>}, {pipeline_mode = #tpu.pipeline_mode<synchronous>, transform_indices = @transform_2, window_bounds = array<i64: 1, 32>}, {pipeline_mode = #tpu.pipeline_mode<synchronous>, transform_indices = @transform_3, window_bounds = array<i64: 32, 6>}, {pipeline_mode = #tpu.pipeline_mode<synchronous>, transform_indices = @transform_4, window_bounds = array<i64: 1, 6>}, {pipeline_mode = #tpu.pipeline_mode<synchronous>, transform_indices = @transform_5, window_bounds = array<i64: 32, 32>}, {pipeline_mode = #tpu.pipeline_mode<synchronous>, transform_indices = @transform_6, window_bounds = array<i64: 1, 32>}, {pipeline_mode = #tpu.pipeline_mode<synchronous>, transform_indices = @transform_7, window_bounds = array<i64: 32, 32>}, {pipeline_mode = #tpu.pipeline_mode<synchronous>, transform_indices = @transform_8, window_bounds = array<i64: 1, 32>}, {pipeline_mode = #tpu.pipeline_mode<synchronous>, transform_indices = @transform_9, window_bounds = array<i64: 32, 32>}, {pipeline_mode = #tpu.pipeline_mode<synchronous>, transform_indices = @transform_10, window_bounds = array<i64: 1, 32>}, {transform_indices = @transform_11, window_bounds = array<i64: 32, 6>}, {transform_indices = @transform_12, window_bounds = array<i64: 32, 32>}]} {
    %c0 = arith.constant 0 : index
    %c0_0 = arith.constant 0 : index
    %0 = vector.load %arg1[%c0, %c0_0] : memref<32x32xf32, #tpu.memory_space<vmem>>, vector<32x32xf32>
    %cst = arith.constant dense<0.000000e+00> : vector<32xf32>
    %1 = vector.multi_reduction <add>, %0, %cst [1] : vector<32x32xf32> to vector<32xf32>
    %2 = vector.shape_cast %1 : vector<32xf32> to vector<32x1xf32>
    %cst_1 = arith.constant 3.200000e+01 : f32
    %3 = vector.broadcast %cst_1 : f32 to vector<32x1xf32>
    %4 = arith.divf %2, %3 : vector<32x1xf32>
    %5 = vector.broadcast %4 : vector<32x1xf32> to vector<32x32xf32>
    %6 = arith.subf %0, %5 : vector<32x32xf32>
    %7 = arith.mulf %6, %6 : vector<32x32xf32>
    %cst_2 = arith.constant dense<0.000000e+00> : vector<32xf32>
    %8 = vector.multi_reduction <add>, %7, %cst_2 [1] : vector<32x32xf32> to vector<32xf32>
    %9 = vector.shape_cast %8 : vector<32xf32> to vector<32x1xf32>
    %cst_3 = arith.constant 3.200000e+01 : f32
    %10 = vector.broadcast %cst_3 : f32 to vector<32x1xf32>
    %11 = arith.divf %9, %10 : vector<32x1xf32>
    %cst_4 = arith.constant 9.99999974E-6 : f32
    %12 = vector.broadcast %cst_4 : f32 to vector<32x1xf32>
    %13 = arith.addf %11, %12 : vector<32x1xf32>
    %14 = math.rsqrt %13 : vector<32x1xf32>
    %15 = vector.broadcast %14 : vector<32x1xf32> to vector<32x32xf32>
    %16 = arith.mulf %6, %15 : vector<32x32xf32>
    %c0_5 = arith.constant 0 : index
    %c0_6 = arith.constant 0 : index
    %17 = vector.load %arg2[%c0_5, %c0_6] : memref<1x32xf32, #tpu.memory_space<vmem>>, vector<1x32xf32>
    %18 = vector.broadcast %17 : vector<1x32xf32> to vector<32x32xf32>
    %19 = arith.mulf %16, %18 : vector<32x32xf32>
    %c0_7 = arith.constant 0 : index
    %c0_8 = arith.constant 0 : index
    %20 = vector.load %arg3[%c0_7, %c0_8] : memref<1x32xf32, #tpu.memory_space<vmem>>, vector<1x32xf32>
    %21 = vector.broadcast %20 : vector<1x32xf32> to vector<32x32xf32>
    %22 = arith.addf %19, %21 : vector<32x32xf32>
    %c0_9 = arith.constant 0 : index
    %c0_10 = arith.constant 0 : index
    %23 = vector.load %arg4[%c0_9, %c0_10] : memref<32x6xf32, #tpu.memory_space<vmem>>, vector<32x6xf32>
    %cst_11 = arith.constant dense<0.000000e+00> : vector<32x6xf32>
    %24 = tpu.matmul %22, %23, %cst_11 {dimension_numbers = #tpu.dot_dimension_numbers<[1], [0], [0], [1], [0, 0, 1, 1], [], []>} : vector<32x32xf32>, vector<32x6xf32>, vector<32x6xf32> -> vector<32x6xf32>
    %c0_12 = arith.constant 0 : index
    %c0_13 = arith.constant 0 : index
    %25 = vector.load %arg5[%c0_12, %c0_13] : memref<1x6xf32, #tpu.memory_space<vmem>>, vector<1x6xf32>
    %26 = vector.broadcast %25 : vector<1x6xf32> to vector<32x6xf32>
    %27 = arith.addf %24, %26 : vector<32x6xf32>
    %c0_14 = arith.constant 0 : index
    %c0_15 = arith.constant 0 : index
    %28 = vector.load %arg12[%c0_14, %c0_15] : memref<32x6xf32, #tpu.memory_space<vmem>>, vector<32x6xf32>
    tpu.vector_store %arg12[%c0_14, %c0_15], %27 {strides = array<i32>} : memref<32x6xf32, #tpu.memory_space<vmem>>, vector<32x6xf32>,
    %c0_16 = arith.constant 0 : index
    %c0_17 = arith.constant 0 : index
    %29 = vector.load %arg6[%c0_16, %c0_17] : memref<32x32xf32, #tpu.memory_space<vmem>>, vector<32x32xf32>
    %cst_18 = arith.constant dense<0.000000e+00> : vector<32x32xf32>
    %30 = tpu.matmul %22, %29, %cst_18 {dimension_numbers = #tpu.dot_dimension_numbers<[1], [0], [0], [1], [0, 0, 1, 1], [], []>} : vector<32x32xf32>, vector<32x32xf32>, vector<32x32xf32> -> vector<32x32xf32>
    %c0_19 = arith.constant 0 : index
    %c0_20 = arith.constant 0 : index
    %31 = vector.load %arg7[%c0_19, %c0_20] : memref<1x32xf32, #tpu.memory_space<vmem>>, vector<1x32xf32>
    %32 = vector.broadcast %31 : vector<1x32xf32> to vector<32x32xf32>
    %33 = arith.addf %30, %32 : vector<32x32xf32>
    %cst_21 = arith.constant 0.000000e+00 : f32
    %34 = vector.broadcast %cst_21 : f32 to vector<32x32xf32>
    %35 = arith.maximumf %33, %34 : vector<32x32xf32>
    %c0_22 = arith.constant 0 : index
    %c0_23 = arith.constant 0 : index
    %36 = vector.load %arg8[%c0_22, %c0_23] : memref<32x32xf32, #tpu.memory_space<vmem>>, vector<32x32xf32>
    %cst_24 = arith.constant dense<0.000000e+00> : vector<32x32xf32>
    %37 = tpu.matmul %35, %36, %cst_24 {dimension_numbers = #tpu.dot_dimension_numbers<[1], [0], [0], [1], [0, 0, 1, 1], [], []>} : vector<32x32xf32>, vector<32x32xf32>, vector<32x32xf32> -> vector<32x32xf32>
    %c0_25 = arith.constant 0 : index
    %c0_26 = arith.constant 0 : index
    %38 = vector.load %arg9[%c0_25, %c0_26] : memref<1x32xf32, #tpu.memory_space<vmem>>, vector<1x32xf32>
    %39 = vector.broadcast %38 : vector<1x32xf32> to vector<32x32xf32>
    %40 = arith.addf %37, %39 : vector<32x32xf32>
    %cst_27 = arith.constant 0.000000e+00 : f32
    %41 = vector.broadcast %cst_27 : f32 to vector<32x32xf32>
    %42 = arith.maximumf %40, %41 : vector<32x32xf32>
    %c0_28 = arith.constant 0 : index
    %c0_29 = arith.constant 0 : index
    %43 = vector.load %arg10[%c0_28, %c0_29] : memref<32x32xf32, #tpu.memory_space<vmem>>, vector<32x32xf32>
    %cst_30 = arith.constant dense<0.000000e+00> : vector<32x32xf32>
    %44 = tpu.matmul %42, %43, %cst_30 {dimension_numbers = #tpu.dot_dimension_numbers<[1], [0], [0], [1], [0, 0, 1, 1], [], []>} : vector<32x32xf32>, vector<32x32xf32>, vector<32x32xf32> -> vector<32x32xf32>
    %c0_31 = arith.constant 0 : index
    %c0_32 = arith.constant 0 : index
    %45 = vector.load %arg11[%c0_31, %c0_32] : memref<1x32xf32, #tpu.memory_space<vmem>>, vector<1x32xf32>
    %46 = vector.broadcast %45 : vector<1x32xf32> to vector<32x32xf32>
    %47 = arith.addf %44, %46 : vector<32x32xf32>
    %c0_33 = arith.constant 0 : index
    %c0_34 = arith.constant 0 : index
    %48 = vector.load %arg13[%c0_33, %c0_34] : memref<32x32xf32, #tpu.memory_space<vmem>>, vector<32x32xf32>
    tpu.vector_store %arg13[%c0_33, %c0_34], %47 {strides = array<i32>} : memref<32x32xf32, #tpu.memory_space<vmem>>, vector<32x32xf32>,
    return
  }
  func.func @transform_0(%arg0: i32) -> (i32, i32) {
    %c0_i32 = arith.constant 0 : i32
    %c0_i32_0 = arith.constant 0 : i32
    return %arg0, %c0_i32 : i32, i32
  }
  func.func @transform_1(%arg0: i32) -> (i32, i32) {
    %c0_i32 = arith.constant 0 : i32
    %c0_i32_0 = arith.constant 0 : i32
    %c0_i32_1 = arith.constant 0 : i32
    return %c0_i32, %c0_i32_0 : i32, i32
  }
  func.func @transform_2(%arg0: i32) -> (i32, i32) {
    %c0_i32 = arith.constant 0 : i32
    %c0_i32_0 = arith.constant 0 : i32
    %c0_i32_1 = arith.constant 0 : i32
    return %c0_i32, %c0_i32_0 : i32, i32
  }
  func.func @transform_3(%arg0: i32) -> (i32, i32) {
    %c0_i32 = arith.constant 0 : i32
    %c0_i32_0 = arith.constant 0 : i32
    %c0_i32_1 = arith.constant 0 : i32
    return %c0_i32, %c0_i32_0 : i32, i32
  }
  func.func @transform_4(%arg0: i32) -> (i32, i32) {
    %c0_i32 = arith.constant 0 : i32
    %c0_i32_0 = arith.constant 0 : i32
    %c0_i32_1 = arith.constant 0 : i32
    return %c0_i32, %c0_i32_0 : i32, i32
  }
  func.func @transform_5(%arg0: i32) -> (i32, i32) {
    %c0_i32 = arith.constant 0 : i32
    %c0_i32_0 = arith.constant 0 : i32
    %c0_i32_1 = arith.constant 0 : i32
    return %c0_i32, %c0_i32_0 : i32, i32
  }
  func.func @transform_6(%arg0: i32) -> (i32, i32) {
    %c0_i32 = arith.constant 0 : i32
    %c0_i32_0 = arith.constant 0 : i32
    %c0_i32_1 = arith.constant 0 : i32
    return %c0_i32, %c0_i32_0 : i32, i32
  }
  func.func @transform_7(%arg0: i32) -> (i32, i32) {
    %c0_i32 = arith.constant 0 : i32
    %c0_i32_0 = arith.constant 0 : i32
    %c0_i32_1 = arith.constant 0 : i32
    return %c0_i32, %c0_i32_0 : i32, i32
  }
  func.func @transform_8(%arg0: i32) -> (i32, i32) {
    %c0_i32 = arith.constant 0 : i32
    %c0_i32_0 = arith.constant 0 : i32
    %c0_i32_1 = arith.constant 0 : i32
    return %c0_i32, %c0_i32_0 : i32, i32
  }
  func.func @transform_9(%arg0: i32) -> (i32, i32) {
    %c0_i32 = arith.constant 0 : i32
    %c0_i32_0 = arith.constant 0 : i32
    %c0_i32_1 = arith.constant 0 : i32
    return %c0_i32, %c0_i32_0 : i32, i32
  }
  func.func @transform_10(%arg0: i32) -> (i32, i32) {
    %c0_i32 = arith.constant 0 : i32
    %c0_i32_0 = arith.constant 0 : i32
    %c0_i32_1 = arith.constant 0 : i32
    return %c0_i32, %c0_i32_0 : i32, i32
  }
  func.func @transform_11(%arg0: i32) -> (i32, i32) {
    %c0_i32 = arith.constant 0 : i32
    %c0_i32_0 = arith.constant 0 : i32
    return %arg0, %c0_i32 : i32, i32
  }
  func.func @transform_12(%arg0: i32) -> (i32, i32) {
    %c0_i32 = arith.constant 0 : i32
    %c0_i32_0 = arith.constant 0 : i32
    return %arg0, %c0_i32 : i32, i32
  }
}

module attributes {stable_mosaic.version = 11 : i64} {
  func.func @_conv1x1_kernel(%arg0: i32, %arg1: i32, %arg2: memref<1x32x256xf32, #tpu.memory_space<vmem>>, %arg3: memref<32x32xf32, #tpu.memory_space<vmem>>, %arg4: memref<32x1xf32, #tpu.memory_space<vmem>>, %arg5: memref<1x32x256xf32, #tpu.memory_space<vmem>>) attributes {dimension_semantics = [#tpu.dimension_semantics<parallel>, #tpu.dimension_semantics<parallel>], iteration_bounds = array<i64: 4, 1>, scalar_prefetch = 0 : i64, scratch_operands = 0 : i64, tpu.core_type = #tpu.core_type<tc>, window_params = [{transform_indices = @transform_0, window_bounds = array<i64: 1, 32, 256>}, {pipeline_mode = #tpu.pipeline_mode<synchronous>, transform_indices = @transform_1, window_bounds = array<i64: 32, 32>}, {pipeline_mode = #tpu.pipeline_mode<synchronous>, transform_indices = @transform_2, window_bounds = array<i64: 32, 1>}, {transform_indices = @transform_3, window_bounds = array<i64: 1, 32, 256>}]} {
    %c0 = arith.constant 0 : index
    %c0_0 = arith.constant 0 : index
    %0 = vector.load %arg3[%c0, %c0_0] : memref<32x32xf32, #tpu.memory_space<vmem>>, vector<32x32xf32>
    %c0_1 = arith.constant 0 : index
    %c0_2 = arith.constant 0 : index
    %c0_3 = arith.constant 0 : index
    %1 = vector.load %arg2[%c0_1, %c0_2, %c0_3] : memref<1x32x256xf32, #tpu.memory_space<vmem>>, vector<1x32x256xf32>
    %2 = vector.shape_cast %1 : vector<1x32x256xf32> to vector<32x256xf32>
    %cst = arith.constant dense<0.000000e+00> : vector<32x256xf32>
    %3 = tpu.matmul %0, %2, %cst {dimension_numbers = #tpu.dot_dimension_numbers<[1], [0], [0], [1], [0, 0, 1, 1], [], []>} : vector<32x32xf32>, vector<32x256xf32>, vector<32x256xf32> -> vector<32x256xf32>
    %c0_4 = arith.constant 0 : index
    %c0_5 = arith.constant 0 : index
    %4 = vector.load %arg4[%c0_4, %c0_5] : memref<32x1xf32, #tpu.memory_space<vmem>>, vector<32x1xf32>
    %5 = vector.broadcast %4 : vector<32x1xf32> to vector<32x256xf32>
    %6 = arith.addf %3, %5 : vector<32x256xf32>
    %c0_6 = arith.constant 0 : index
    %c0_7 = arith.constant 0 : index
    %c0_8 = arith.constant 0 : index
    %7 = vector.load %arg5[%c0_6, %c0_7, %c0_8] : memref<1x32x256xf32, #tpu.memory_space<vmem>>, vector<1x32x256xf32>
    %8 = vector.shape_cast %7 : vector<1x32x256xf32> to vector<32x256xf32>
    %9 = vector.shape_cast %6 : vector<32x256xf32> to vector<1x32x256xf32>
    tpu.vector_store %arg5[%c0_6, %c0_7, %c0_8], %9 {strides = array<i32>} : memref<1x32x256xf32, #tpu.memory_space<vmem>>, vector<1x32x256xf32>,
    return
  }
  func.func @transform_0(%arg0: i32, %arg1: i32) -> (i32, i32, i32) {
    %c0_i32 = arith.constant 0 : i32
    %c0_i32_0 = arith.constant 0 : i32
    return %arg0, %c0_i32, %arg1 : i32, i32, i32
  }
  func.func @transform_1(%arg0: i32, %arg1: i32) -> (i32, i32) {
    %c0_i32 = arith.constant 0 : i32
    %c0_i32_0 = arith.constant 0 : i32
    %c0_i32_1 = arith.constant 0 : i32
    return %c0_i32, %c0_i32_0 : i32, i32
  }
  func.func @transform_2(%arg0: i32, %arg1: i32) -> (i32, i32) {
    %c0_i32 = arith.constant 0 : i32
    %c0_i32_0 = arith.constant 0 : i32
    %c0_i32_1 = arith.constant 0 : i32
    return %c0_i32, %c0_i32_0 : i32, i32
  }
  func.func @transform_3(%arg0: i32, %arg1: i32) -> (i32, i32, i32) {
    %c0_i32 = arith.constant 0 : i32
    %c0_i32_0 = arith.constant 0 : i32
    return %arg0, %c0_i32, %arg1 : i32, i32, i32
  }
}

module attributes {stable_mosaic.version = 11 : i64} {
  func.func @_mask_bmm_kernel(%arg0: i32, %arg1: i32, %arg2: memref<1x8x32xf32, #tpu.memory_space<vmem>>, %arg3: memref<1x32x256xf32, #tpu.memory_space<vmem>>, %arg4: memref<1x8x256xf32, #tpu.memory_space<vmem>>) attributes {dimension_semantics = [#tpu.dimension_semantics<parallel>, #tpu.dimension_semantics<parallel>], iteration_bounds = array<i64: 4, 1>, scalar_prefetch = 0 : i64, scratch_operands = 0 : i64, tpu.core_type = #tpu.core_type<tc>, window_params = [{transform_indices = @transform_0, window_bounds = array<i64: 1, 8, 32>}, {transform_indices = @transform_1, window_bounds = array<i64: 1, 32, 256>}, {transform_indices = @transform_2, window_bounds = array<i64: 1, 8, 256>}]} {
    %c0 = arith.constant 0 : index
    %c0_0 = arith.constant 0 : index
    %c0_1 = arith.constant 0 : index
    %0 = vector.load %arg2[%c0, %c0_0, %c0_1] : memref<1x8x32xf32, #tpu.memory_space<vmem>>, vector<1x8x32xf32>
    %1 = vector.shape_cast %0 : vector<1x8x32xf32> to vector<8x32xf32>
    %c0_2 = arith.constant 0 : index
    %c0_3 = arith.constant 0 : index
    %c0_4 = arith.constant 0 : index
    %2 = vector.load %arg3[%c0_2, %c0_3, %c0_4] : memref<1x32x256xf32, #tpu.memory_space<vmem>>, vector<1x32x256xf32>
    %3 = vector.shape_cast %2 : vector<1x32x256xf32> to vector<32x256xf32>
    %cst = arith.constant dense<0.000000e+00> : vector<8x256xf32>
    %4 = tpu.matmul %1, %3, %cst {dimension_numbers = #tpu.dot_dimension_numbers<[1], [0], [0], [1], [0, 0, 1, 1], [], []>} : vector<8x32xf32>, vector<32x256xf32>, vector<8x256xf32> -> vector<8x256xf32>
    %c0_5 = arith.constant 0 : index
    %c0_6 = arith.constant 0 : index
    %c0_7 = arith.constant 0 : index
    %5 = vector.load %arg4[%c0_5, %c0_6, %c0_7] : memref<1x8x256xf32, #tpu.memory_space<vmem>>, vector<1x8x256xf32>
    %6 = vector.shape_cast %5 : vector<1x8x256xf32> to vector<8x256xf32>
    %7 = vector.shape_cast %4 : vector<8x256xf32> to vector<1x8x256xf32>
    tpu.vector_store %arg4[%c0_5, %c0_6, %c0_7], %7 {strides = array<i32>} : memref<1x8x256xf32, #tpu.memory_space<vmem>>, vector<1x8x256xf32>,
    return
  }
  func.func @transform_0(%arg0: i32, %arg1: i32) -> (i32, i32, i32) {
    %c0_i32 = arith.constant 0 : i32
    %c0_i32_0 = arith.constant 0 : i32
    %c0_i32_1 = arith.constant 0 : i32
    return %arg0, %c0_i32, %c0_i32_0 : i32, i32, i32
  }
  func.func @transform_1(%arg0: i32, %arg1: i32) -> (i32, i32, i32) {
    %c4_i32 = arith.constant 4 : i32
    %c0_i32 = arith.constant 0 : i32
    %0 = arith.cmpi eq, %c4_i32, %c0_i32 : i32
    %c1_i32 = arith.constant 1 : i32
    %1 = arith.select %0, %c1_i32, %c4_i32 : i32
    %2 = arith.remsi %arg0, %1 : i32
    %c0_i32_0 = arith.constant 0 : i32
    %3 = arith.cmpi ne, %2, %c0_i32_0 : i32
    %c0_i32_1 = arith.constant 0 : i32
    %4 = arith.cmpi slt, %2, %c0_i32_1 : i32
    %c0_i32_2 = arith.constant 0 : i32
    %5 = arith.cmpi slt, %1, %c0_i32_2 : i32
    %6 = arith.xori %4, %5 : i1
    %7 = arith.andi %6, %3 : i1
    %8 = arith.addi %2, %1 : i32
    %9 = arith.select %7, %8, %2 : i32
    %c0_i32_3 = arith.constant 0 : i32
    %c0_i32_4 = arith.constant 0 : i32
    return %9, %c0_i32_3, %arg1 : i32, i32, i32
  }
  func.func @transform_2(%arg0: i32, %arg1: i32) -> (i32, i32, i32) {
    %c0_i32 = arith.constant 0 : i32
    %c0_i32_0 = arith.constant 0 : i32
    return %arg0, %c0_i32, %arg1 : i32, i32, i32
  }
}

</mosaic_0001>

<bundles_post_ra>
// kernel: referring_tracker_forward.7
= control target key start
LH: loop header
LB: loop body
LE: loop exit
PB: predicated region body
PF: predicated region fallthrough
CT: control target
= control target key end

     0   :  { %s546_s12 = smov 0   ;;  %s548_s13 = smov 0   ;;  %s610_s0 = inlined_call_operand.vmem [shape: f32[4,32,256], index: 0, kind: input, shape index: {}]   ;;  %s611_s1 = inlined_call_operand.vmem [shape: f32[32,32], index: 1, kind: input, shape index: {}]   ;;  %s612_s2 = inlined_call_operand.vmem [shape: f32[32,1], index: 2, kind: input, shape index: {}]   ;;  %s613_s3 = inlined_call_operand.vmem [shape: f32[4,32,256], index: 3, kind: output, shape index: {}]  }
   0x1   :  { %s550_s14 = smov 0  }
   0x2 LB: > { %s25_s15 = sadd.s32 1, %s518_s13  ;;  %p447_p0 = scmp.ge.s32.totalorder %s522_s14, 1  ;;  %s522_s14 = sphi %s550_s14, %s13_s14   ;;  %s518_s13 = sphi %s548_s13, %s615_s13   ;;  %s514_s12 = sphi %s546_s12, %s614_s12  }
   0x3   : > { %p27_p1 = scmp.ge.s32.totalorder %s25_s15, 4  ;;  %p158_p2 = scmp.lt.s32.totalorder %s522_s14, 5 }
   0x5   : > { %s617_s15 = smov (%p27_p1, %s25_s15), 0  ;;  %p159_p3 = pnand %p447_p0, %p158_p2 }
   0x6   : > { %p191_p4 = scmp.lt.s32.totalorder (!%p159_p3), %s514_s12, 3  ;;  %v524_v0 = vmov (!%p159_p3), 0.0   ;;  %v224_v1 = vld [vmem:[%s612_s2 + $0x10] sm:$0xff] (!%p159_p3)  ;;  %v222_v2 = vld [vmem:[%s612_s2] sm:$0xff] (!%p159_p3)  ;;  %v525_v3 = vmov (!%p159_p3), 0   ;;  %v225_v4 = vld [vmem:[%s612_s2 + $0x18] sm:$0xff] (!%p159_p3) }
   0x7   : > { %162 = sbr.rel (%p159_p3) target bundleno = 248 (0xf8), region = 32  ;;  %323 = vmatprep.mubr.f32.mxu0 (!%p159_p3), %v524_v0  ;;  %335 = vmatprep.mubr.f32.mxu1 (!%p159_p3), %v524_v0  ;;  %v223_v5 = vld [vmem:[%s612_s2 + $0x8] sm:$0xff] (!%p159_p3)  ;;  %v210_v18 = vld [vmem:[%s611_s1] sm:$0xff] (!%p159_p3)  ;;  %vm246_vm0 = vcmask (!%p159_p3), 261120   ;;  %v212_v19 = vld [vmem:[%s611_s1 + $0x10] sm:$0xff] (!%p159_p3) }
   0x8   : > { %499 = vset.pattern.permute.xlu1 (!%p159_p3), %v525_v3  ;;  %498 = vset.pattern.permute.xlu0 (!%p159_p3), %v525_v3  ;;  %v211_v20 = vld [vmem:[%s611_s1 + $0x8] sm:$0xff] (!%p159_p3)  ;;  %v213_v21 = vld [vmem:[%s611_s1 + $0x18] sm:$0xff] (!%p159_p3) }
   0x9   : > { %238 = vperm.xlu1 (!%p159_p3), %499, %v224_v1   ;;  %228 = vperm.xlu0 (!%p159_p3), %498, %v222_v2  }
   0xd   : > { %243 = vperm.xlu1 (!%p159_p3), %499, %v225_v4   ;;  %233 = vperm.xlu0 (!%p159_p3), %498, %v223_v5  }
   0xe   : > { %s619_s12 = smov (!%p191_p4, %s514_s12), 3 }
   0xf   : > { %s458_s20 = sshll.u32 %s619_s12, 6 }
  0x10   : > { %s198_s27 = scalar_lea.vmem %s610_s0, %s458_s20  ;;  %s208_s11 = scalar_lea.vmem %s613_s3, %s458_s20 }
  0x11   : > { %v215_v6 = vld [vmem:[%s198_s27 + $0x8] sm:$0xff]  ;;  %v217_v7 = vld [vmem:[%s198_s27 + $0x18] sm:$0xff]  ;;  %v214_v8 = vld [vmem:[%s198_s27] sm:$0xff] }
  0x12   : > { %v460_v9 = vpack.c.bf16 %v217_v7, %v215_v6  ;;  %v216_v10 = vld [vmem:[%s198_s27 + $0x10] sm:$0xff]  ;;  %v219_v11 = vld [vmem:[%s198_s27 + $0x28] sm:$0xff]  ;;  %v221_v12 = vld [vmem:[%s198_s27 + $0x38] sm:$0xff] }
  0x13   : > { %v462_v13 = vpack.c.bf16 %v216_v10, %v214_v8  ;;  %v464_v14 = vpack.c.bf16 %v221_v12, %v219_v11  ;;  %v218_v15 = vld [vmem:[%s198_s27 + $0x20] sm:$0xff]  ;;  %v220_v16 = vld [vmem:[%s198_s27 + $0x30] sm:$0xff] }
  0x14   : > { %461 = vmatprep.subr.bf16.mxu0 %v460_v9  ;;  %468 = vmatprep.subr.bf16.mxu1 %v460_v9  ;;  %v466_v17 = vpack.c.bf16 %v220_v16, %v218_v15 }
  0x15   : > { %463 = vmatpush1.bf16.msra.mxu0 %v462_v13  ;;  %470 = vmatpush1.bf16.msra.mxu1 %v462_v13 }
  0x16   : > { %465 = vmatprep.subr.bf16.mxu0 %v464_v14  ;;  %469 = vmatprep.subr.bf16.mxu1 %v464_v14 }
  0x19   : > { %467 = vmatpush1.bf16.msra.mxu0 %v466_v17  ;;  %471 = vmatpush1.bf16.msra.mxu1 %v466_v17 }
  0x1c   : > { %452 = vmatmul.mubr.msk.f32.vlgmr.msra.gmra.mrb[0].mxu0 %vm246_vm0, %v210_v18  ;;  %454 = vmatmul.mubr.msk.f32.vlgmr.msra.gmra.mrb[0].mxu1 %vm246_vm0, %v212_v19 }
  0x1d   : > { %329 = vmatprep.mubr.f32.mxu0 %v524_v0  ;;  %341 = vmatprep.mubr.f32.mxu1 %v524_v0 }
  0x20   : > { %453 = vmatmul.mubr.msk.f32.gmra.mrb[2].mxu0 %vm246_vm0, %v211_v20  ;;  %455 = vmatmul.mubr.msk.f32.gmra.mrb[2].mxu1 %vm246_vm0, %v213_v21 }
  0x88   : > { %v239_v22 = vpop.permute.xlu1 %238  ;;  %v229_v23 = vpop.permute.xlu0 %228 }
  0x8c   : > { %v244_v32 = vpop.permute.xlu1 %243  ;;  %v234_v33 = vpop.permute.xlu0 %233 }
  0xef   : > { %v325_v24 = vpop.f32.mrb[0].mxu0  ;;  %v337_v25 = vpop.f32.mrb[0].mxu1 }
  0xf0   : > { %v326_v26 = vadd.f32 %v325_v24, %v229_v23  ;;  %v338_v27 = vadd.f32 %v337_v25, %v239_v22  ;;  %v327_v28 = vpop.f32.mrb[1].mxu0  ;;  %v339_v29 = vpop.f32.mrb[1].mxu1 }
  0xf1   : > { %v328_v30 = vadd.f32 %v327_v28, %v229_v23  ;;  %v340_v31 = vadd.f32 %v339_v29, %v239_v22 }
  0xf2   : > { %348 = vst [vmem:[%s208_s11] sm:$0xff] %v326_v26  ;;  %352 = vst [vmem:[%s208_s11 + $0x20] sm:$0xff] %v338_v27 }
  0xf3   : > { %349 = vst [vmem:[%s208_s11 + $0x8] sm:$0xff] %v328_v30  ;;  %353 = vst [vmem:[%s208_s11 + $0x28] sm:$0xff] %v340_v31  ;;  %v331_v34 = vpop.f32.mrb[2].mxu0  ;;  %v343_v35 = vpop.f32.mrb[2].mxu1 }
  0xf4   : > { %v332_v36 = vadd.f32 %v331_v34, %v234_v33  ;;  %v344_v37 = vadd.f32 %v343_v35, %v244_v32  ;;  %v333_v38 = vpop.f32.mrb[3].mxu0  ;;  %v345_v39 = vpop.f32.mrb[3].mxu1 }
  0xf5   : > { %v334_v40 = vadd.f32 %v333_v38, %v234_v33  ;;  %v346_v41 = vadd.f32 %v345_v39, %v244_v32 }
  0xf6   : > { %350 = vst [vmem:[%s208_s11 + $0x10] sm:$0xff] %v332_v36  ;;  %354 = vst [vmem:[%s208_s11 + $0x30] sm:$0xff] %v344_v37 }
  0xf7   : > { %351 = vst [vmem:[%s208_s11 + $0x18] sm:$0xff] %v334_v40  ;;  %355 = vst [vmem:[%s208_s11 + $0x38] sm:$0xff] %v346_v41 }
  0xf8 PF: > { %s13_s14 = sadd.s32 1, %s522_s14   ;;  %s614_s12 = smov %s518_s13 }
  0xf9   : > { %p10_p5 = scmp.ge.s32.totalorder %s13_s14, 6   ;;  %s615_s13 = smov %s617_s15 }
  0xfb   :  { %12 = sbr.rel (!%p10_p5) target bundleno = 2 (0x2), region = 62 }

// kernel: referring_tracker_forward.12
= control target key start
LH: loop header
LB: loop body
LE: loop exit
PB: predicated region body
PF: predicated region fallthrough
CT: control target
= control target key end

     0   :  { %vm44_vm0 = vcmask 261120   ;;  %vm228_vm1 = vcmask 48128   ;;  %s934_s0 = inlined_call_operand.vmem [shape: f32[32,32], index: 0, kind: input, shape index: {}]   ;;  %s935_s3 = inlined_call_operand.vmem [shape: f32[32,6], index: 3, kind: input, shape index: {}]   ;;  %s936_s5 = inlined_call_operand.vmem [shape: f32[32,32], index: 5, kind: input, shape index: {}]   ;;  %s937_s7 = inlined_call_operand.vmem [shape: f32[32,32], index: 7, kind: input, shape index: {}]   ;;  %s938_s1 = inlined_call_operand.vmem [shape: f32[1,32], index: 1, kind: input, shape index: {}]   ;;  %s939_s2 = inlined_call_operand.vmem [shape: f32[1,32], index: 2, kind: input, shape index: {}]   ;;  %s940_s9 = inlined_call_operand.vmem [shape: f32[32,32], index: 9, kind: input, shape index: {}]   ;;  %s941_s4 = inlined_call_operand.vmem [shape: f32[1,6], index: 4, kind: input, shape index: {}]   ;;  %s942_s6 = inlined_call_operand.vmem [shape: f32[1,32], index: 6, kind: input, shape index: {}]   ;;  %s943_s11 = inlined_call_operand.vmem [shape: f32[32,6], index: 11, kind: output, shape index: {0}]   ;;  %s944_s8 = inlined_call_operand.vmem [shape: f32[1,32], index: 8, kind: input, shape index: {}]   ;;  %s945_s10 = inlined_call_operand.vmem [shape: f32[1,32], index: 10, kind: input, shape index: {}]   ;;  %s946_s12 = inlined_call_operand.vmem [shape: f32[32,32], index: 12, kind: output, shape index: {1}]  }
   0x1   :  { %v40_v0 = vld [vmem:[%s934_s0] sm:$0xff]  ;;  %v42_v1 = vld [vmem:[%s934_s0 + $0x10] sm:$0xff]  ;;  %v41_v2 = vld [vmem:[%s934_s0 + $0x8] sm:$0xff] }
   0x2   :  { %v45_v3 = vsel %vm44_vm0, %v40_v0, 0.0  ;;  %v51_v4 = vsel %vm44_vm0, %v42_v1, 0.0  ;;  %v43_v5 = vld [vmem:[%s934_s0 + $0x18] sm:$0xff]  ;;  %v48_v6 = vsel %vm44_vm0, %v41_v2, 0.0  ;;  %v120_v28 = vld [vmem:[%s935_s3] sm:$0xff]  ;;  %v121_v29 = vld [vmem:[%s935_s3 + $0x8] sm:$0xff] }
   0x3   :  { %46 = vadd.xlane.f32.xlu0 %v45_v3  ;;  %52 = vadd.xlane.f32.xlu1 %v51_v4  ;;  %v54_v7 = vsel %vm44_vm0, %v43_v5, 0.0  ;;  %v233_v30 = vld [vmem:[%s936_s5] sm:$0xff]  ;;  %v675_v31 = vpack.c.bf16 %v121_v29, %v120_v28  ;;  %v234_v32 = vld [vmem:[%s936_s5 + $0x8] sm:$0xff]  ;;  %v122_v33 = vld [vmem:[%s935_s3 + $0x10] sm:$0xff] }
   0x4   :  { %v123_v34 = vld [vmem:[%s935_s3 + $0x18] sm:$0xff]  ;;  %v683_v35 = vpack.c.bf16 %v234_v32, %v233_v30  ;;  %v235_v37 = vld [vmem:[%s936_s5 + $0x10] sm:$0xff]  ;;  %v333_v40 = vld [vmem:[%s937_s7] sm:$0xff] }
   0x5   :  { %v679_v36 = vpack.c.bf16 %v123_v34, %v122_v33  ;;  %676 = vmatprep.subr.bf16.mxu0 %v675_v31  ;;  %v236_v38 = vld [vmem:[%s936_s5 + $0x18] sm:$0xff]  ;;  %v334_v41 = vld [vmem:[%s937_s7 + $0x8] sm:$0xff]  ;;  %v565_v56 = vld [vmem:[%s938_s1] ss:$0 sm:$0xff] }
   0x6   :  { %684 = vmatprep.subr.bf16.mxu1 %v683_v35  ;;  %678 = vmatpush3.bf16.msra.mxu0 %v675_v31  ;;  %v687_v39 = vpack.c.bf16 %v236_v38, %v235_v37  ;;  %v691_v42 = vpack.c.bf16 %v334_v41, %v333_v40  ;;  %v566_v58 = vld [vmem:[%s939_s2] ss:$0 sm:$0xff]  ;;  %v447_v37 = vld [vmem:[%s940_s9 + $0x10] sm:$0xff]  ;;  %v448_v38 = vld [vmem:[%s940_s9 + $0x18] sm:$0xff] }
   0x7   :  { %49 = vadd.xlane.f32.xlu0 %v48_v6  ;;  %55 = vadd.xlane.f32.xlu1 %v54_v7  ;;  %v577_v40 = vld [vmem:[%s944_s8] ss:$0 sm:$0xff] }
   0x8   :  { %686 = vmatpush3.bf16.msra.mxu1 %v683_v35  ;;  %680 = vmatprep.subr.bf16.mxu0 %v679_v36 }
   0x9   :  { %688 = vmatprep.subr.bf16.mxu1 %v687_v39 }
   0xa   :  { %682 = vmatpush3.bf16.msra.mxu0 %v679_v36 }
   0xb   :  { %692 = vmatprep.subr.bf16.mxu0 %v691_v42 }
   0xc   :  { %690 = vmatpush3.bf16.msra.mxu1 %v687_v39  ;;  %v703_v39 = vpack.c.bf16 %v448_v38, %v447_v37 }
  0x90   :  { %v47_v8 = vpop.xlane.xlu0 %46  ;;  %v53_v9 = vpop.xlane.xlu1 %52 }
  0x91   :  { %v58_v10 = vmul.f32 0.03125, %v47_v8  ;;  %v60_v11 = vmul.f32 0.03125, %v53_v9  ;;  %v335_v9 = vld [vmem:[%s937_s7 + $0x10] sm:$0xff] }
  0x93   :  { %v796_v12 = vsub.f32 %v40_v0, %v58_v10  ;;  %v798_v13 = vsub.f32 %v42_v1, %v60_v11  ;;  %v336_v10 = vld [vmem:[%s937_s7 + $0x18] sm:$0xff] }
  0x94   :  { %v50_v14 = vpop.xlane.xlu0 %49  ;;  %v56_v15 = vpop.xlane.xlu1 %55  ;;  %v695_v11 = vpack.c.bf16 %v336_v10, %v335_v9 }
  0x95   :  { %v59_v16 = vmul.f32 0.03125, %v50_v14  ;;  %v61_v17 = vmul.f32 0.03125, %v56_v15  ;;  %v66_v18 = vmul.f32 %v796_v12, %v796_v12  ;;  %v68_v19 = vmul.f32 %v798_v13, %v798_v13  ;;  %v567_v15 = vld [vmem:[%s941_s4] ss:$0 sm:$0xff] }
  0x97   :  { %v804_v20 = vsub.f32 %v41_v2, %v59_v16  ;;  %v806_v21 = vsub.f32 %v43_v5, %v61_v17  ;;  %v70_v22 = vsel %vm44_vm0, %v66_v18, 0.0  ;;  %v76_v23 = vsel %vm44_vm0, %v68_v19, 0.0  ;;  %v572_v16 = vld [vmem:[%s942_s6] ss:$0 sm:$0xff] }
  0x98   :  { %71 = vadd.xlane.f32.xlu0 %v70_v22 }
  0x99   :  { %v67_v24 = vmul.f32 %v804_v20, %v804_v20  ;;  %v69_v25 = vmul.f32 %v806_v21, %v806_v21 }
  0x9b   :  { %v73_v26 = vsel %vm44_vm0, %v67_v24, 0.0  ;;  %v79_v27 = vsel %vm44_vm0, %v69_v25, 0.0 }
  0x9c   :  { %77 = vadd.xlane.f32.xlu0 %v76_v23  ;;  %74 = vadd.xlane.f32.xlu1 %v73_v26 }
  0xa0   :  { %80 = vadd.xlane.f32.xlu1 %v79_v27 }
 0x125   :  { %v72_v43 = vpop.xlane.xlu0 %71 }
 0x126   :  { %v82_v44 = vmul.f32 0.03125, %v72_v43 }
 0x128   :  { %v86_v45 = vadd.f32 1e-05, %v82_v44 }
 0x129   :  { %v75_v46 = vpop.xlane.xlu1 %74  ;;  %v78_v47 = vpop.xlane.xlu0 %77 }
 0x12a   :  { %707 = vrsqrt.f32 %v86_v45  ;;  %v83_v48 = vmul.f32 0.03125, %v75_v46  ;;  %v84_v49 = vmul.f32 0.03125, %v78_v47 }
 0x12c   :  { %v87_v50 = vadd.f32 1e-05, %v83_v48  ;;  %v88_v51 = vadd.f32 1e-05, %v84_v49 }
 0x12d   :  { %v81_v52 = vpop.xlane.xlu1 %80 }
 0x12e   :  { %709 = vrsqrt.f32 %v87_v50  ;;  %v85_v53 = vmul.f32 0.03125, %v81_v52 }
 0x12f   :  { %711 = vrsqrt.f32 %v88_v51 }
 0x130   :  { %v89_v54 = vadd.f32 1e-05, %v85_v53  ;;  %v582_v53 = vld [vmem:[%s945_s10] ss:$0 sm:$0xff] }
 0x132   :  { %713 = vrsqrt.f32 %v89_v54 }
 0x134   :  { %v708_v55 = vpop.eup %707 }
 0x135   :  { %v94_v57 = vmul.f32 %v708_v55, %v796_v12  ;;  %v445_v12 = vld [vmem:[%s940_s9] sm:$0xff] }
 0x137   :  { %v105_v59 = vmul.f32 %v565_v56, %v94_v57 }
 0x138   :  { %v710_v60 = vpop.eup %709 }
 0x139   :  { %v712_v61 = vpop.eup %711  ;;  %v116_v62 = vadd.f32 %v566_v58, %v105_v59  ;;  %v95_v63 = vmul.f32 %v710_v60, %v804_v20 }
 0x13a   :  { %v96_v0 = vmul.f32 %v712_v61, %v798_v13  ;;  %v446_v13 = vld [vmem:[%s940_s9 + $0x8] sm:$0xff] }
 0x13b   :  { %627 = vmatprep.mubr.msk.f32.mxu0 %vm44_vm0, %v116_v62  ;;  %641 = vmatprep.mubr.msk.f32.mxu1 %vm44_vm0, %v116_v62  ;;  %v106_v1 = vmul.f32 %v565_v56, %v95_v63  ;;  %v699_v14 = vpack.c.bf16 %v446_v13, %v445_v12 }
 0x13c   :  { %v714_v2 = vpop.eup %713  ;;  %v107_v3 = vmul.f32 %v565_v56, %v96_v0 }
 0x13d   :  { %v117_v4 = vadd.f32 %v566_v58, %v106_v1  ;;  %v97_v5 = vmul.f32 %v714_v2, %v806_v21  ;;  %700 = vmatprep.subr.bf16.mxu1 %v699_v14 }
 0x13e   :  { %v118_v6 = vadd.f32 %v566_v58, %v107_v3 }
 0x13f   :  { %628 = vmatmul.mubr.msk.f32.vlgmr.msra.gmra.mrb[0].mxu0 %vm44_vm0, %v117_v4  ;;  %642 = vmatmul.mubr.msk.f32.vlgmr.msra.gmra.mrb[0].mxu1 %vm44_vm0, %v117_v4  ;;  %v108_v7 = vmul.f32 %v565_v56, %v97_v5 }
 0x140   :  { %630 = vmatprep.mubr.msk.f32.mxu0 %vm44_vm0, %v118_v6  ;;  %644 = vmatprep.mubr.msk.f32.mxu1 %vm44_vm0, %v118_v6 }
 0x141   :  { %v119_v8 = vadd.f32 %v566_v58, %v108_v7  ;;  %694 = vmatpush3.bf16.msra.mxu0 %v691_v42  ;;  %702 = vmatpush3.bf16.msra.mxu1 %v699_v14 }
 0x142   :  { %696 = vmatprep.subr.bf16.mxu0 %v695_v11  ;;  %704 = vmatprep.subr.bf16.mxu1 %v703_v39 }
 0x143   :  { %631 = vmatmul.mubr.msk.f32.gmra.mrb[2].mxu0 %vm44_vm0, %v119_v8  ;;  %645 = vmatmul.mubr.msk.f32.gmra.mrb[2].mxu1 %vm44_vm0, %v119_v8 }
 0x145   :  { %698 = vmatpush3.bf16.msra.mxu0 %v695_v11  ;;  %706 = vmatpush3.bf16.msra.mxu1 %v703_v39 }
 0x212   :  { %v629_v17 = vpop.f32.mrb[0].mxu0  ;;  %v643_v18 = vpop.f32.mrb[0].mxu1 }
 0x213   :  { %v215_v19 = vadd.f32 %v629_v17, %v567_v15  ;;  %v316_v20 = vadd.f32 %v643_v18, %v572_v16  ;;  %v209_v21 = vpop.f32.mrb[1].mxu0  ;;  %v310_v22 = vpop.f32.mrb[1].mxu1 }
 0x214   :  { %v210_v23 = vadd.f32 %v567_v15, %v209_v21  ;;  %v311_v24 = vadd.f32 %v572_v16, %v310_v22 }
 0x215   :  { %230 = vst.msk [vmem:[%s943_s11 + $0x8] sm:$0xff] %vm228_vm1, %v215_v19  ;;  %v330_v28 = vmax.f32 %v316_v20, 0.0 }
 0x216   :  { %229 = vst.msk [vmem:[%s943_s11] sm:$0xff] %vm228_vm1, %v210_v23  ;;  %v329_v25 = vmax.f32 %v311_v24, 0.0  ;;  %v632_v26 = vpop.f32.mrb[2].mxu0  ;;  %v646_v27 = vpop.f32.mrb[2].mxu1 }
 0x217   :  { %v225_v29 = vadd.f32 %v632_v26, %v567_v15  ;;  %v326_v30 = vadd.f32 %v646_v27, %v572_v16  ;;  %v219_v31 = vpop.f32.mrb[3].mxu0  ;;  %v320_v32 = vpop.f32.mrb[3].mxu1 }
 0x218   :  { %v220_v33 = vadd.f32 %v567_v15, %v219_v31  ;;  %v321_v34 = vadd.f32 %v572_v16, %v320_v32  ;;  %655 = vmatprep.mubr.msk.f32.mxu0 %vm44_vm0, %v329_v25 }
 0x219   :  { %232 = vst.msk [vmem:[%s943_s11 + $0x18] sm:$0xff] %vm228_vm1, %v225_v29  ;;  %656 = vmatmul.mubr.msk.f32.vlgmr.msra.gmra.mrb[4].mxu0 %vm44_vm0, %v330_v28  ;;  %v332_v36 = vmax.f32 %v326_v30, 0.0 }
 0x21a   :  { %231 = vst.msk [vmem:[%s943_s11 + $0x10] sm:$0xff] %vm228_vm1, %v220_v33  ;;  %v331_v35 = vmax.f32 %v321_v34, 0.0 }
 0x21c   :  { %658 = vmatprep.mubr.msk.f32.mxu0 %vm44_vm0, %v331_v35 }
 0x21d   :  { %659 = vmatmul.mubr.msk.f32.gmra.mrb[6].mxu0 %vm44_vm0, %v332_v36 }
 0x2ec   :  { %v657_v41 = vpop.f32.mrb[4].mxu0 }
 0x2ed   :  { %v428_v42 = vadd.f32 %v657_v41, %v577_v40  ;;  %v422_v43 = vpop.f32.mrb[5].mxu0 }
 0x2ee   :  { %v423_v44 = vadd.f32 %v577_v40, %v422_v43 }
 0x2ef   :  { %v442_v47 = vmax.f32 %v428_v42, 0.0 }
 0x2f0   :  { %v441_v45 = vmax.f32 %v423_v44, 0.0  ;;  %v660_v46 = vpop.f32.mrb[6].mxu0 }
 0x2f1   :  { %v438_v48 = vadd.f32 %v660_v46, %v577_v40  ;;  %v432_v49 = vpop.f32.mrb[7].mxu0 }
 0x2f2   :  { %v433_v50 = vadd.f32 %v577_v40, %v432_v49  ;;  %669 = vmatprep.mubr.msk.f32.mxu1 %vm44_vm0, %v441_v45 }
 0x2f3   :  { %670 = vmatmul.mubr.msk.f32.vlgmr.msra.gmra.mrb[4].mxu1 %vm44_vm0, %v442_v47  ;;  %v444_v52 = vmax.f32 %v438_v48, 0.0 }
 0x2f4   :  { %v443_v51 = vmax.f32 %v433_v50, 0.0 }
 0x2f6   :  { %672 = vmatprep.mubr.msk.f32.mxu1 %vm44_vm0, %v443_v51 }
 0x2f7   :  { %673 = vmatmul.mubr.msk.f32.gmra.mrb[6].mxu1 %vm44_vm0, %v444_v52 }
 0x3c6   :  { %v671_v54 = vpop.f32.mrb[4].mxu1 }
 0x3c7   :  { %v540_v55 = vadd.f32 %v671_v54, %v582_v53  ;;  %v534_v56 = vpop.f32.mrb[5].mxu1 }
 0x3c8   :  { %v535_v57 = vadd.f32 %v582_v53, %v534_v56 }
 0x3c9   :  { %554 = vst.msk [vmem:[%s946_s12 + $0x8] sm:$0xff] %vm44_vm0, %v540_v55 }
 0x3ca   :  { %553 = vst.msk [vmem:[%s946_s12] sm:$0xff] %vm44_vm0, %v535_v57  ;;  %v674_v58 = vpop.f32.mrb[6].mxu1 }
 0x3cb   :  { %v550_v59 = vadd.f32 %v674_v58, %v582_v53  ;;  %v544_v60 = vpop.f32.mrb[7].mxu1 }
 0x3cc   :  { %v545_v61 = vadd.f32 %v582_v53, %v544_v60 }
 0x3cd   :  { %556 = vst.msk [vmem:[%s946_s12 + $0x18] sm:$0xff] %vm44_vm0, %v550_v59 }
 0x3ce   :  { %555 = vst.msk [vmem:[%s946_s12 + $0x10] sm:$0xff] %vm44_vm0, %v545_v61 }

// kernel: referring_tracker_forward.13
= control target key start
LH: loop header
LB: loop body
LE: loop exit
PB: predicated region body
PF: predicated region fallthrough
CT: control target
= control target key end

     0   :  { %s566_s9 = smov 0   ;;  %s568_s10 = smov 0   ;;  %s602_s0 = inlined_call_operand.vmem [shape: f32[4,8,32], index: 0, kind: input, shape index: {}]   ;;  %s603_s1 = inlined_call_operand.vmem [shape: f32[4,32,256], index: 1, kind: input, shape index: {}]   ;;  %s604_s2 = inlined_call_operand.vmem [shape: f32[4,8,256], index: 2, kind: output, shape index: {}]  }
   0x1   :  { %s570_s11 = smov 0  }
   0x2 LB: > { %s24_s12 = sadd.s32 1, %s544_s10  ;;  %p479_p0 = scmp.ge.s32.totalorder %s548_s11, 1  ;;  %s548_s11 = sphi %s570_s11, %s12_s11   ;;  %s544_s10 = sphi %s568_s10, %s606_s10   ;;  %s540_s9 = sphi %s566_s9, %s605_s9  }
   0x3   : > { %p26_p1 = scmp.ge.s32.totalorder %s24_s12, 4  ;;  %p190_p2 = scmp.lt.s32.totalorder %s548_s11, 5 }
   0x5   : > { %s608_s12 = smov (%p26_p1, %s24_s12), 0  ;;  %p191_p3 = pnand %p479_p0, %p190_p2 }
   0x6   : > { %p240_p4 = scmp.lt.s32.totalorder (!%p191_p3), %s540_s9, 0  ;;  %s241_s13 = ssub.s32 (!%p191_p3), 0, %s540_s9  ;;  %v550_v0 = vmov (!%p191_p3), 0.0   ;;  %vm293_vm0 = vcmask (!%p191_p3), 261120  }
   0x7   : > { %194 = sbr.rel (%p191_p3) target bundleno = 248 (0xf8), region = 28  ;;  %s481_s14 = smin.u32 (!%p191_p3), %s540_s9, %s241_s13  ;;  %361 = vmatprep.mubr.f32.mxu0 (!%p191_p3), %v550_v0 }
   0x8   : > { %s243_s15 = sand.u32 (!%p191_p3), 3, %s481_s14   ;;  %p236_p6 = scmp.lt.s32.totalorder (!%p191_p3), %s540_s9, 3 }
   0x9   : > { %s244_s16 = ssub.s32 (!%p191_p3), 0, %s243_s15 }
   0xe   : > { %s610_s16 = smov (!%p240_p4, %s244_s16), %s243_s15  ;;  %s616_s9 = smov (!%p236_p6, %s540_s9), 3 }
   0xf   : > { %p483_p5 = scmp.lt.s32.totalorder %s610_s16, 0  ;;  %s250_s17 = sadd.s32 4, %s610_s16 }
  0x10   : > { %s480_s22 = sshll.u32 %s616_s9, 3  ;;  %s492_s26 = sshll.u32 %s616_s9, 4 }
  0x11   : > { %s612_s17 = smov (!%p483_p5, %s250_s17), %s610_s16  ;;  %s239_s25 = scalar_lea.vmem %s602_s0, %s480_s22 }
  0x12   : > { %p253_p7 = scmp.lt.s32.totalorder %s612_s17, 3  ;;  %v284_v13 = vld [vmem:[%s239_s25] sm:$0xff]  ;;  %s282_s29 = scalar_lea.vmem %s604_s2, %s492_s26 }
  0x14   : > { %s614_s17 = smov (!%p253_p7, %s612_s17), 3 }
  0x15   : > { %s491_s18 = sshll.u32 %s614_s17, 6 }
  0x16   : > { %s260_s21 = scalar_lea.vmem %s603_s1, %s491_s18 }
  0x17   : > { %v286_v1 = vld [vmem:[%s260_s21 + $0x8] sm:$0xff]  ;;  %v288_v2 = vld [vmem:[%s260_s21 + $0x18] sm:$0xff]  ;;  %v285_v3 = vld [vmem:[%s260_s21] sm:$0xff] }
  0x18   : > { %v493_v4 = vpack.c.bf16 %v288_v2, %v286_v1  ;;  %v287_v5 = vld [vmem:[%s260_s21 + $0x10] sm:$0xff]  ;;  %v290_v6 = vld [vmem:[%s260_s21 + $0x28] sm:$0xff]  ;;  %v292_v7 = vld [vmem:[%s260_s21 + $0x38] sm:$0xff] }
  0x19   : > { %v495_v8 = vpack.c.bf16 %v287_v5, %v285_v3  ;;  %v497_v9 = vpack.c.bf16 %v292_v7, %v290_v6  ;;  %v289_v10 = vld [vmem:[%s260_s21 + $0x20] sm:$0xff]  ;;  %v291_v11 = vld [vmem:[%s260_s21 + $0x30] sm:$0xff] }
  0x1a   : > { %494 = vmatprep.subr.bf16.mxu0 %v493_v4  ;;  %v499_v12 = vpack.c.bf16 %v291_v11, %v289_v10 }
  0x1b   : > { %496 = vmatpush1.bf16.msra.mxu0 %v495_v8 }
  0x1c   : > { %498 = vmatprep.subr.bf16.mxu0 %v497_v9 }
  0x1f   : > { %500 = vmatpush1.bf16.msra.mxu0 %v499_v12 }
  0x22   : > { %488 = vmatmul.mubr.msk.f32.vlgmr.msra.gmra.mrb[0].mxu0 %vm293_vm0, %v284_v13 }
  0xf5   : > { %v363_v14 = vpop.f32.mrb[0].mxu0 }
  0xf6   : > { %368 = vst [vmem:[%s282_s29] sm:$0xff] %v363_v14  ;;  %v365_v15 = vpop.f32.mrb[1].mxu0 }
  0xf7   : > { %369 = vst [vmem:[%s282_s29 + $0x8] sm:$0xff] %v365_v15 }
  0xf8 PF: > { %s12_s11 = sadd.s32 1, %s548_s11   ;;  %s605_s9 = smov %s544_s10 }
  0xf9   : > { %p9_p8 = scmp.ge.s32.totalorder %s12_s11, 6   ;;  %s606_s10 = smov %s608_s12 }
  0xfb   :  { %11 = sbr.rel (!%p9_p8) target bundleno = 2 (0x2), region = 61 }

// kernel: referring_tracker_forward.8
= control target key start
LH: loop header
LB: loop body
LE: loop exit
PB: predicated region body
PF: predicated region fallthrough
CT: control target
= control target key end

     0   :  { %v2795_v0 = vmov 0.0|0.0   ;;  %vm2796_vm0 = vmmov 0   ;;  %v2797_v8 = vmov 0.0   ;;  %vm89_vm1 = vcmask 261120   ;;  %s3292_s3 = inlined_call_operand.vmem [shape: f32[3,32,32], index: 3, kind: input, shape index: {}]   ;;  %s3293_s1 = inlined_call_operand.vmem [shape: f32[1,8,32], index: 1, kind: input, shape index: {}, may-alias: {0,1,2}]   ;;  %s3294_s2 = inlined_call_operand.vmem [shape: f32[1,8,32], index: 2, kind: input, shape index: {}, may-alias: {0,1,2}]   ;;  %s3295_s4 = inlined_call_operand.vmem [shape: f32[3,1,32], index: 4, kind: input, shape index: {}]   ;;  %s3296_s5 = inlined_call_operand.vmem [shape: f32[32,32], index: 5, kind: input, shape index: {}]   ;;  %s3297_s6 = inlined_call_operand.vmem [shape: f32[1,32], index: 6, kind: input, shape index: {}]   ;;  %s3298_s0 = inlined_call_operand.vmem [shape: f32[1,8,32], index: 0, kind: input, shape index: {}, may-alias: {0,1,2}]   ;;  %s3299_s9 = inlined_call_operand.vmem [shape: f32[3,32,32], index: 9, kind: input, shape index: {}]   ;;  %s3300_s7 = inlined_call_operand.vmem [shape: f32[1,32], index: 7, kind: input, shape index: {}]   ;;  %s3301_s8 = inlined_call_operand.vmem [shape: f32[1,32], index: 8, kind: input, shape index: {}]   ;;  %s3302_s10 = inlined_call_operand.vmem [shape: f32[3,1,32], index: 10, kind: input, shape index: {}]   ;;  %s3303_s11 = inlined_call_operand.vmem [shape: f32[32,32], index: 11, kind: input, shape index: {}]   ;;  %s3304_s12 = inlined_call_operand.vmem [shape: f32[1,32], index: 12, kind: input, shape index: {}]   ;;  %s3305_s15 = inlined_call_operand.vmem [shape: f32[32,64], index: 15, kind: input, shape index: {}]   ;;  %s3306_s17 = inlined_call_operand.vmem [shape: f32[64,32], index: 17, kind: input, shape index: {}]   ;;  %s3307_s13 = inlined_call_operand.vmem [shape: f32[1,32], index: 13, kind: input, shape index: {}]   ;;  %s3308_s14 = inlined_call_operand.vmem [shape: f32[1,32], index: 14, kind: input, shape index: {}]   ;;  %s3309_s16 = inlined_call_operand.vmem [shape: f32[1,64], index: 16, kind: input, shape index: {}]   ;;  %s3310_s18 = inlined_call_operand.vmem [shape: f32[1,32], index: 18, kind: input, shape index: {}]   ;;  %s3311_s19 = inlined_call_operand.vmem [shape: f32[1,32], index: 19, kind: input, shape index: {}]   ;;  %s3312_s20 = inlined_call_operand.vmem [shape: f32[1,32], index: 20, kind: input, shape index: {}]   ;;  %s3313_s21 = inlined_call_operand.vmem [shape: f32[1,8,32], index: 21, kind: output, shape index: {}]  }
   0x1   :  { %3317 = sst [smem:[#allocation2_spill]] %s3292_s3  ;;  %2676 = vmatprep.subr.bf16.mxu0 %v2795_v0  ;;  %2682 = vmatprep.subr.bf16.mxu1 %v2795_v0  ;;  %v68_v22 = vlaneseq  ;;  %vm414_vm12 = vcmask 64512   ;;  %vm2213_vm13 = vcmask 523264  }
   0x2   :  { %3318 = sst [smem:[#allocation3_spill]] %s3293_s1  ;;  %s3323_s26 = sld [smem:[#allocation2_spill]]  ;;  %2486 = vmatprep.mubr.msk.f32.mxu0 %vm2796_vm0, %v2797_v8  ;;  %2497 = vmatprep.mubr.msk.f32.mxu1 %vm2796_vm0, %v2797_v8 }
   0x3   :  { %3319 = sst [smem:[#allocation4_spill]] %s3294_s2  ;;  %s3324_s30 = sld [smem:[#allocation3_spill]]  ;;  %v69_v23 = vand.u32 127, %v68_v22 }
   0x4   :  { %3320 = sst [smem:[#allocation5_spill]] %s3295_s4  ;;  %s3325_s23 = sld [smem:[#allocation4_spill]] }
   0x5   :  { %3321 = sst [smem:[#allocation6_spill]] %s3296_s5  ;;  %vm427_vm2 = vcmp.ge.s32.totalorder %v69_v23, 8  ;;  %vm428_vm3 = vcmp.lt.s32.totalorder %v69_v23, 16  ;;  %vm333_vm4 = vcmp.lt.s32.totalorder %v69_v23, 8  ;;  %s3326_s4 = sld [smem:[#allocation5_spill]]  ;;  %vm664_vm6 = vcmp.ge.s32.totalorder %v69_v23, 16 }
   0x6   :  { %3322 = sst [smem:[#allocation7_spill]] %s3297_s6  ;;  %vm429_vm5 = vmand %vm427_vm2, %vm428_vm3  ;;  %v2978_v27 = vsel %vm333_vm4, 1.0, %v2797_v8  ;;  %vm665_vm7 = vcmp.lt.s32.totalorder %v69_v23, 24  ;;  %vm829_vm9 = vcmp.ge.s32.totalorder %v69_v23, 24  ;;  %vm830_vm10 = vcmp.lt.s32.totalorder %v69_v23, 32  ;;  %s3327_s22 = sld [smem:[#allocation6_spill]] }
   0x7   :  { %v2981_v28 = vsel %vm429_vm5, 1.0, %v2797_v8  ;;  %vm666_vm8 = vmand %vm664_vm6, %vm665_vm7  ;;  %s3328_s28 = sld [smem:[#allocation7_spill]] }
   0x8   :  { %v78_v1 = vld [vmem:[%s3323_s26] sm:$0xff]  ;;  %v79_v2 = vld [vmem:[%s3323_s26 + $0x8] sm:$0xff]  ;;  %v80_v6 = vld [vmem:[%s3323_s26 + $0x10] sm:$0xff]  ;;  %v2990_v36 = vsel %vm666_vm8, 1.0, %v2797_v8 }
   0x9   :  { %v2324_v3 = vld [vmem:[%s3323_s26 + $0x20] sm:$0xff]  ;;  %v2677_v4 = vpack.c.bf16 %v79_v2, %v78_v1  ;;  %v2325_v5 = vld [vmem:[%s3323_s26 + $0x28] sm:$0xff]  ;;  %v81_v7 = vld [vmem:[%s3323_s26 + $0x18] sm:$0xff] }
   0xa   :  { %v2683_v9 = vpack.c.bf16 %v2325_v5, %v2324_v3  ;;  %v2326_v10 = vld [vmem:[%s3323_s26 + $0x30] sm:$0xff]  ;;  %v2327_v11 = vld [vmem:[%s3323_s26 + $0x38] sm:$0xff]  ;;  %v2680_v12 = vpack.c.bf16 %v81_v7, %v80_v6  ;;  %v2331_v14 = vld [vmem:[%s3323_s26 + $0x40] sm:$0xff] }
   0xb   :  { %2678 = vmatpush3.bf16.msra.mxu0 %v2677_v4  ;;  %v2686_v13 = vpack.c.bf16 %v2327_v11, %v2326_v10  ;;  %v2332_v15 = vld [vmem:[%s3323_s26 + $0x48] sm:$0xff]  ;;  %v71_v16 = vld [vmem:[%s3324_s30] sm:$0xff]  ;;  %v2333_v19 = vld [vmem:[%s3323_s26 + $0x50] sm:$0xff] }
   0xc   :  { %2684 = vmatpush3.bf16.msra.mxu1 %v2683_v9  ;;  %2679 = vmatprep.subr.bf16.mxu0 %v2795_v0  ;;  %v2689_v17 = vpack.c.bf16 %v2332_v15, %v2331_v14  ;;  %v72_v18 = vld [vmem:[%s3325_s23] sm:$0xff]  ;;  %v2334_v20 = vld [vmem:[%s3323_s26 + $0x58] sm:$0xff]  ;;  %vm831_vm11 = vmand %vm829_vm9, %vm830_vm10 }
   0xd   :  { %2685 = vmatprep.subr.bf16.mxu1 %v2795_v0  ;;  %v2692_v21 = vpack.c.bf16 %v2334_v20, %v2333_v19  ;;  %v2322_v24 = vld [vmem:[%s3326_s4] ss:$0 sm:$0xff]  ;;  %v2329_v25 = vld [vmem:[%s3326_s4 + $0x1] ss:$0 sm:$0xff]  ;;  %v3002_v40 = vsel %vm831_vm11, 1.0, %v2797_v8  ;;  %v74_v20 = vld [vmem:[%s3327_s22 + $0x8] sm:$0xff] }
   0xe   :  { %v2336_v42 = vld [vmem:[%s3326_s4 + $0x2] ss:$0 sm:$0xff]  ;;  %v76_v23 = vld [vmem:[%s3327_s22 + $0x18] sm:$0xff] }
   0xf   :  { %2681 = vmatpush3.bf16.msra.mxu0 %v2680_v12  ;;  %v73_v19 = vld [vmem:[%s3327_s22] sm:$0xff] }
  0x10   :  { %2687 = vmatpush3.bf16.msra.mxu1 %v2686_v13  ;;  %2688 = vmatprep.subr.bf16.mxu0 %v2795_v0  ;;  %v2695_v22 = vpack.c.bf16 %v74_v20, %v73_v19  ;;  %v2365_v20 = vld [vmem:[%s3299_s9 + $0x50] sm:$0xff] }
  0x11   :  { %2516 = vmatprep.subr.mxu1 %v2797_v8 }
  0x12   :  { %2487 = vmatmul.mubr.msk.f32.vlgmr.msra.gmra.mrb[0].mxu0 %vm89_vm1, %v71_v16 }
  0x13   :  { %2498 = vmatmul.mubr.msk.f32.vlgmr.msra.gmra.mrb[0].mxu1 %vm89_vm1, %v72_v18  ;;  %2690 = vmatpush3.bf16.msra.mxu0 %v2689_v17 }
  0x14   :  { %2691 = vmatprep.subr.bf16.mxu0 %v2795_v0  ;;  %2508 = vmatprep.mubr.msk.f32.mxu0 %vm2796_vm0, %v2797_v8 }
  0x15   :  { %2518 = vmatprep.mubr.msk.f32.mxu1 %vm2796_vm0, %v2797_v8 }
  0x17   :  { %2693 = vmatpush3.bf16.msra.mxu0 %v2692_v21  ;;  %v75_v21 = vld [vmem:[%s3327_s22 + $0x10] sm:$0xff] }
  0x18   :  { %2511 = vmatprep.subr.mxu0 %v2797_v8 }
  0x1a   :  { %2509 = vmatmul.mubr.msk.f32.vlgmr.msra.gmra.mrb[2].mxu0 %vm89_vm1, %v72_v18 }
  0x1b   :  { %2513 = vmatprep.mubr.msk.f32.mxu0 %vm2796_vm0, %v2797_v8 }
  0xe5   :  { %v159_v26 = vpop.f32.mrb[0].mxu0 }
  0xe6   :  { %v160_v29 = vadd.f32 %v2322_v24, %v159_v26  ;;  %v245_v30 = vpop.f32.mrb[0].mxu1  ;;  %v2488_v31 = vpop.f32.mrb[1].mxu0  ;;  %v2698_v24 = vpack.c.bf16 %v76_v23, %v75_v21  ;;  %v2366_v21 = vld [vmem:[%s3299_s9 + $0x58] sm:$0xff]  ;;  %v2354_v23 = vld [vmem:[%s3302_s10] ss:$0 sm:$0xff] }
  0xe7   :  { %v246_v32 = vadd.f32 %v2329_v25, %v245_v30  ;;  %v2499_v33 = vpop.f32.mrb[1].mxu1 }
  0xe8   :  { %v336_v34 = vmul.f32 %v2978_v27, %v160_v29  ;;  %v431_v35 = vmul.f32 %v2981_v28, %v160_v29  ;;  %v668_v38 = vmul.f32 %v2990_v36, %v160_v29  ;;  %v833_v41 = vmul.f32 %v3002_v40, %v160_v29 }
  0xe9   :  { %2512 = vmatpush3.xpose.msk.msra.mxu0 %vm89_vm1, %v246_v32  ;;  %2517 = vmatpush3.xpose.msk.msra.mxu1 %vm89_vm1, %v246_v32 }
  0xea   :  { %2531 = vmatprep.subr.mxu1 %v2797_v8  ;;  %2521 = vmatprep.subr.mxu0 %v2797_v8 }
  0xec   :  { %2514 = vmatmul.mubr.msk.f32.vlgmr.msra.gmra.mrb[4].mxu0 %vm89_vm1, %v336_v34  ;;  %2519 = vmatmul.mubr.msk.f32.vlgmr.msra.gmra.mrb[2].mxu1 %vm89_vm1, %v431_v35 }
  0xed   :  { %2532 = vmatpush3.xpose.msk.msra.mxu1 %vm89_vm1, %v246_v32  ;;  %2533 = vmatprep.mubr.msk.f32.mxu1 %vm2796_vm0, %v2797_v8  ;;  %v328_v37 = vpop.f32.mrb[2].mxu0 }
  0xee   :  { %2541 = vmatprep.subr.mxu1 %v2797_v8  ;;  %v2510_v39 = vpop.f32.mrb[3].mxu0  ;;  %2523 = vmatprep.mubr.msk.f32.mxu0 %vm2796_vm0, %v2797_v8  ;;  %v3016_v43 = vadd.f32 %v2336_v42, %v328_v37 }
  0xf0   :  { %2534 = vmatmul.mubr.msk.f32.vlgmr.msra.gmra.mrb[4].mxu1 %vm89_vm1, %v668_v38  ;;  %v517_v44 = vmul.f32 %v2981_v28, %v3016_v43  ;;  %v754_v37 = vmul.f32 %v2990_v36, %v3016_v43 }
  0xf1   :  { %2542 = vmatpush3.xpose.msk.msra.mxu1 %vm89_vm1, %v246_v32  ;;  %2543 = vmatprep.mubr.msk.f32.mxu1 %vm2796_vm0, %v2797_v8  ;;  %v426_v32 = vmul.f32 %v2978_v27, %v3016_v43 }
  0xf2   :  { %2694 = vmatprep.subr.bf16.mxu1 %v2795_v0  ;;  %2522 = vmatpush3.msra.mxu0 %v517_v44 }
  0xf3   :  { %2526 = vmatprep.subr.mxu0 %v2797_v8 }
  0xf4   :  { %2544 = vmatmul.mubr.msk.f32.vlgmr.msra.gmra.mrb[6].mxu1 %vm89_vm1, %v833_v41  ;;  %v919_v41 = vmul.f32 %v3002_v40, %v3016_v43  ;;  %v2350_v43 = vld [vmem:[%s3328_s28] ss:$0 sm:$0xff] }
  0xf5   :  { %2559 = vmatprep.mubr.msk.f32.mxu1 %vm2796_vm0, %v2797_v8  ;;  %2696 = vmatpush3.bf16.msra.mxu1 %v2695_v22  ;;  %v2716_v22 = vpack.c.bf16 %v2366_v21, %v2365_v20  ;;  %v1106_v20 = vld [vmem:[%s3303_s11 + $0x10] sm:$0xff] }
  0xf6   :  { %2697 = vmatprep.subr.bf16.mxu1 %v2795_v0 }
  0xf9   :  { %2699 = vmatpush3.bf16.msra.mxu1 %v2698_v24  ;;  %v2361_v24 = vld [vmem:[%s3302_s10 + $0x1] ss:$0 sm:$0xff] }
  0xfa   :  { %2706 = vmatprep.subr.bf16.mxu1 %v2795_v0 }
 0x1bf   :  { %v409_v45 = vpop.f32.mrb[4].mxu0  ;;  %v501_v46 = vpop.f32.mrb[2].mxu1 }
 0x1c0   :  { %v505_v47 = vmul.f32 0.35355338, %v501_v46  ;;  %v2515_v48 = vpop.f32.mrb[5].mxu0  ;;  %v2520_v49 = vpop.f32.mrb[3].mxu1  ;;  %v413_v50 = vmul.f32 0.35355338, %v409_v45 }
 0x1c1   :  { %v70_v48 = vld [vmem:[%s3298_s0] sm:$0xff] }
 0x1c2   :  { %v506_v51 = vsel %vm414_vm12, %v505_v47, -inf  ;;  %v415_v56 = vsel %vm414_vm12, %v413_v50, -inf }
 0x1c3   :  { %507 = vmax.xlane.f32.xlu0 %v506_v51  ;;  %v738_v52 = vpop.f32.mrb[4].mxu1 }
 0x1c4   :  { %v742_v53 = vmul.f32 0.35355338, %v738_v52  ;;  %v2535_v54 = vpop.f32.mrb[5].mxu1 }
 0x1c6   :  { %v743_v55 = vsel %vm414_vm12, %v742_v53, -inf }
 0x1c7   :  { %744 = vmax.xlane.f32.xlu1 %v743_v55  ;;  %v903_v57 = vpop.f32.mrb[6].mxu1  ;;  %416 = vmax.xlane.f32.xlu0 %v415_v56 }
 0x1c8   :  { %v907_v58 = vmul.f32 0.35355338, %v903_v57  ;;  %v2545_v59 = vpop.f32.mrb[7].mxu1 }
 0x1c9   :  { %v1110_v59 = vld [vmem:[%s3299_s9 + $0x8] sm:$0xff] }
 0x1ca   :  { %v908_v60 = vsel %vm414_vm12, %v907_v58, -inf }
 0x1cb   :  { %909 = vmax.xlane.f32.xlu1 %v908_v60 }
 0x250   :  { %v508_v61 = vpop.xlane.xlu0 %507 }
 0x251   :  { %v509_v62 = vsub.f32 %v505_v47, %v508_v61  ;;  %v2356_v61 = vld [vmem:[%s3299_s9 + $0x20] sm:$0xff] }
 0x253   :  { %v510_v63 = vmul.f32 1.442695, %v509_v62  ;;  %v2357_v62 = vld [vmem:[%s3299_s9 + $0x28] sm:$0xff] }
 0x254   :  { %v745_v1 = vpop.xlane.xlu1 %744  ;;  %v417_v2 = vpop.xlane.xlu0 %416 }
 0x255   :  { %2757 = vpow2.f32 %v510_v63  ;;  %v746_v3 = vsub.f32 %v742_v53, %v745_v1  ;;  %v418_v4 = vsub.f32 %v413_v50, %v417_v2  ;;  %v2707_v63 = vpack.c.bf16 %v2357_v62, %v2356_v61  ;;  %v1111_v1 = vld [vmem:[%s3299_s9 + $0x10] sm:$0xff]  ;;  %v1112_v2 = vld [vmem:[%s3299_s9 + $0x18] sm:$0xff] }
 0x257   :  { %v747_v5 = vmul.f32 1.442695, %v746_v3  ;;  %v419_v6 = vmul.f32 1.442695, %v418_v4  ;;  %v2358_v3 = vld [vmem:[%s3299_s9 + $0x30] sm:$0xff]  ;;  %v2704_v4 = vpack.c.bf16 %v1112_v2, %v1111_v1 }
 0x258   :  { %v910_v7 = vpop.xlane.xlu1 %909 }
 0x259   :  { %2759 = vpow2.f32 %v747_v5  ;;  %v911_v9 = vsub.f32 %v907_v58, %v910_v7  ;;  %v1109_v58 = vld [vmem:[%s3299_s9] sm:$0xff]  ;;  %v2359_v5 = vld [vmem:[%s3299_s9 + $0x38] sm:$0xff] }
 0x25a   :  { %2761 = vpow2.f32 %v419_v6  ;;  %v2701_v60 = vpack.c.bf16 %v1110_v59, %v1109_v58  ;;  %v2710_v6 = vpack.c.bf16 %v2359_v5, %v2358_v3 }
 0x25b   :  { %v912_v10 = vmul.f32 1.442695, %v911_v9 }
 0x25d   :  { %2763 = vpow2.f32 %v912_v10 }
 0x25f   :  { %v2758_v11 = vpop.eup %2757 }
 0x260   :  { %v512_v12 = vsel %vm414_vm12, %v2758_v11, 0.0 }
 0x261   :  { %513 = vadd.xlane.f32.xlu0 %v512_v12  ;;  %v2352_v12 = vld [vmem:[%s3300_s7] ss:$0 sm:$0xff] }
 0x263   :  { %v2760_v13 = vpop.eup %2759 }
 0x264   :  { %v2762_v14 = vpop.eup %2761  ;;  %v749_v15 = vsel %vm414_vm12, %v2760_v13, 0.0 }
 0x265   :  { %750 = vadd.xlane.f32.xlu0 %v749_v15  ;;  %v421_v16 = vsel %vm414_vm12, %v2762_v14, 0.0  ;;  %v2364_v15 = vld [vmem:[%s3299_s9 + $0x48] sm:$0xff] }
 0x266   :  { %422 = vadd.xlane.f32.xlu1 %v421_v16  ;;  %v2353_v16 = vld [vmem:[%s3301_s8] ss:$0 sm:$0xff] }
 0x267   :  { %v2764_v17 = vpop.eup %2763 }
 0x268   :  { %v914_v18 = vsel %vm414_vm12, %v2764_v17, 0.0 }
 0x26a   :  { %915 = vadd.xlane.f32.xlu1 %v914_v18 }
 0x2ee   :  { %v514_v25 = vpop.xlane.xlu0 %513 }
 0x2ef   :  { %2765 = vrcp.f32 %v514_v25 }
 0x2f2   :  { %v751_v31 = vpop.xlane.xlu0 %750 }
 0x2f3   :  { %v423_v26 = vpop.xlane.xlu1 %422 }
 0x2f4   :  { %2767 = vrcp.f32 %v423_v26 }
 0x2f5   :  { %2769 = vrcp.f32 %v751_v31 }
 0x2f7   :  { %v916_v35 = vpop.xlane.xlu1 %915 }
 0x2f8   :  { %2771 = vrcp.f32 %v916_v35 }
 0x2f9   :  { %v2766_v29 = vpop.eup %2765 }
 0x2fa   :  { %v516_v30 = vmul.f32 %v2766_v29, %v2758_v11 }
 0x2fc   :  { %2524 = vmatmul.mubr.msk.f32.vlgmr.msra.gmra.mrb[6].mxu0 %vm414_vm12, %v516_v30 }
 0x2fd   :  { %2527 = vmatpush3.msra.mxu0 %v426_v32  ;;  %2528 = vmatprep.mubr.msk.f32.mxu0 %vm2796_vm0, %v2797_v8 }
 0x2fe   :  { %2536 = vmatprep.subr.mxu0 %v2797_v8  ;;  %v2768_v33 = vpop.eup %2767 }
 0x2ff   :  { %v425_v34 = vmul.f32 %v2768_v33, %v2762_v14  ;;  %v2770_v38 = vpop.eup %2769  ;;  %v2363_v14 = vld [vmem:[%s3299_s9 + $0x40] sm:$0xff] }
 0x300   :  { %v753_v39 = vmul.f32 %v2770_v38, %v2760_v13  ;;  %v2713_v18 = vpack.c.bf16 %v2364_v15, %v2363_v14 }
 0x302   :  { %v2772_v42 = vpop.eup %2771 }
 0x303   :  { %v918_v44 = vmul.f32 %v2772_v42, %v2764_v17 }
 0x304   :  { %2529 = vmatmul.mubr.msk.f32.vlgmr.msra.gmra.mrb[6].mxu0 %vm414_vm12, %v425_v34  ;;  %v2368_v34 = vld [vmem:[%s3302_s10 + $0x2] ss:$0 sm:$0xff] }
 0x305   :  { %2537 = vmatpush3.msra.mxu0 %v754_v37  ;;  %2538 = vmatprep.mubr.msk.f32.mxu0 %vm2796_vm0, %v2797_v8 }
 0x306   :  { %2546 = vmatprep.subr.mxu0 %v2797_v8 }
 0x30c   :  { %2539 = vmatmul.mubr.msk.f32.vlgmr.msra.gmra.mrb[6].mxu0 %vm414_vm12, %v753_v39 }
 0x30d   :  { %2547 = vmatpush3.msra.mxu0 %v919_v41  ;;  %2548 = vmatprep.mubr.msk.f32.mxu0 %vm2796_vm0, %v2797_v8 }
 0x30e   :  { %2700 = vmatprep.subr.bf16.mxu0 %v2795_v0 }
 0x314   :  { %2549 = vmatmul.mubr.msk.f32.vlgmr.msra.gmra.mrb[6].mxu0 %vm414_vm12, %v918_v44 }
 0x315   :  { %2570 = vmatprep.mubr.msk.f32.mxu0 %vm2796_vm0, %v2797_v8  ;;  %2702 = vmatpush3.bf16.msra.mxu0 %v2701_v60 }
 0x316   :  { %2703 = vmatprep.subr.bf16.mxu0 %v2795_v0 }
 0x319   :  { %2705 = vmatpush3.bf16.msra.mxu0 %v2704_v4 }
 0x31a   :  { %2712 = vmatprep.subr.bf16.mxu0 %v2795_v0 }
 0x3e7   :  { %v989_v45 = vpop.f32.mrb[6].mxu0 }
 0x3e8   :  { %v2550_v46 = vpop.f32.mrb[7].mxu0  ;;  %2560 = vmatmul.mubr.msk.f32.vlgmr.msra.gmra.mrb[8].mxu1 %vm89_vm1, %v989_v45 }
 0x3e9   :  { %2581 = vmatprep.mubr.msk.f32.mxu1 %vm2796_vm0, %v2797_v8  ;;  %2708 = vmatpush3.bf16.msra.mxu1 %v2707_v63 }
 0x3ea   :  { %2709 = vmatprep.subr.bf16.mxu1 %v2795_v0 }
 0x3ed   :  { %2711 = vmatpush3.bf16.msra.mxu1 %v2710_v6 }
 0x3ee   :  { %2595 = vmatprep.subr.mxu1 %v2797_v8 }
 0x4bb   :  { %v1069_v47 = vpop.f32.mrb[8].mxu1 }
 0x4bc   :  { %v1070_v49 = vadd.f32 %v2350_v43, %v1069_v47  ;;  %v2561_v50 = vpop.f32.mrb[9].mxu1 }
 0x4be   :  { %v1073_v51 = vadd.f32 %v1070_v49, %v70_v48 }
 0x4c0   :  { %v1076_v52 = vsel %vm89_vm1, %v1073_v51, 0.0 }
 0x4c1   :  { %1077 = vadd.xlane.f32.xlu0 %v1076_v52 }
 0x54e   :  { %v1078_v53 = vpop.xlane.xlu0 %1077 }
 0x54f   :  { %v1080_v54 = vmul.f32 0.03125, %v1078_v53 }
 0x551   :  { %v1081_v55 = vsub.f32 %v1073_v51, %v1080_v54 }
 0x553   :  { %v1082_v56 = vmul.f32 %v1081_v55, %v1081_v55 }
 0x555   :  { %v1083_v57 = vsel %vm89_vm1, %v1082_v56, 0.0 }
 0x556   :  { %1084 = vadd.xlane.f32.xlu1 %v1083_v57 }
 0x5e3   :  { %v1085_v7 = vpop.xlane.xlu1 %1084 }
 0x5e4   :  { %v1086_v9 = vmul.f32 0.03125, %v1085_v7 }
 0x5e6   :  { %v1087_v10 = vadd.f32 1e-05, %v1086_v9 }
 0x5e8   :  { %2773 = vrsqrt.f32 %v1087_v10 }
 0x5f2   :  { %v2774_v11 = vpop.eup %2773 }
 0x5f3   :  { %v1089_v13 = vmul.f32 %v2774_v11, %v1081_v55 }
 0x5f5   :  { %v1096_v17 = vmul.f32 %v2352_v12, %v1089_v13 }
 0x5f7   :  { %v3115_v19 = vadd.f32 %v2353_v16, %v1096_v17  ;;  %v1104_v17 = vld [vmem:[%s3303_s11] sm:$0xff] }
 0x5f9   :  { %2571 = vmatmul.mubr.msk.f32.vlgmr.msra.gmra.mrb[8].mxu0 %vm89_vm1, %v3115_v19  ;;  %2582 = vmatmul.mubr.msk.f32.vlgmr.msra.gmra.mrb[10].mxu1 %vm89_vm1, %v3115_v19 }
 0x5fa   :  { %2714 = vmatpush3.bf16.msra.mxu0 %v2713_v18  ;;  %2592 = vmatprep.mubr.msk.f32.mxu0 %vm2796_vm0, %v2797_v8  ;;  %v1105_v18 = vld [vmem:[%s3303_s11 + $0x8] sm:$0xff] }
 0x5fb   :  { %2715 = vmatprep.subr.bf16.mxu0 %v2795_v0  ;;  %2597 = vmatprep.mubr.msk.f32.mxu1 %vm2796_vm0, %v2797_v8  ;;  %v2719_v21 = vpack.c.bf16 %v1105_v18, %v1104_v17 }
 0x5fe   :  { %2717 = vmatpush3.bf16.msra.mxu0 %v2716_v22  ;;  %v1107_v22 = vld [vmem:[%s3303_s11 + $0x18] sm:$0xff] }
 0x5ff   :  { %2605 = vmatprep.subr.mxu0 %v2797_v8 }
 0x601   :  { %2593 = vmatmul.mubr.msk.f32.vlgmr.msra.gmra.mrb[10].mxu0 %vm89_vm1, %v3115_v19 }
 0x602   :  { %2607 = vmatprep.mubr.msk.f32.mxu0 %vm2796_vm0, %v2797_v8 }
 0x6cc   :  { %v1189_v25 = vpop.f32.mrb[8].mxu0  ;;  %v1272_v26 = vpop.f32.mrb[10].mxu1 }
 0x6cd   :  { %v1190_v29 = vadd.f32 %v2354_v23, %v1189_v25  ;;  %v1273_v30 = vadd.f32 %v2361_v24, %v1272_v26  ;;  %v2572_v31 = vpop.f32.mrb[9].mxu0  ;;  %v2583_v32 = vpop.f32.mrb[11].mxu1  ;;  %v2722_v23 = vpack.c.bf16 %v1107_v22, %v1106_v20  ;;  %v2388_v20 = vld [vmem:[%s3310_s18] ss:$0 sm:$0xff] }
 0x6cf   :  { %v1359_v33 = vmul.f32 %v1190_v29, %v2978_v27  ;;  %2596 = vmatpush3.xpose.msk.msra.mxu1 %vm89_vm1, %v1273_v30  ;;  %v1449_v35 = vmul.f32 %v1190_v29, %v2981_v28  ;;  %v1682_v42 = vmul.f32 %v1190_v29, %v2990_v36  ;;  %v1843_v44 = vmul.f32 %v1190_v29, %v3002_v40 }
 0x6d0   :  { %2600 = vmatprep.subr.mxu1 %v2797_v8 }
 0x6d2   :  { %2598 = vmatmul.mubr.msk.f32.vlgmr.msra.gmra.mrb[12].mxu1 %vm89_vm1, %v1359_v33 }
 0x6d3   :  { %2601 = vmatpush3.xpose.msk.msra.mxu1 %vm89_vm1, %v1273_v30  ;;  %2602 = vmatprep.mubr.msk.f32.mxu1 %vm2796_vm0, %v2797_v8 }
 0x6d4   :  { %v1355_v37 = vpop.f32.mrb[10].mxu0  ;;  %2615 = vmatprep.subr.mxu1 %v2797_v8 }
 0x6d5   :  { %v3155_v38 = vadd.f32 %v2368_v34, %v1355_v37  ;;  %v2594_v39 = vpop.f32.mrb[11].mxu0 }
 0x6d6   :  { %2603 = vmatmul.mubr.msk.f32.vlgmr.msra.gmra.mrb[14].mxu1 %vm89_vm1, %v1449_v35 }
 0x6d7   :  { %2616 = vmatpush3.xpose.msk.msra.mxu1 %vm89_vm1, %v1273_v30  ;;  %v1535_v41 = vmul.f32 %v3155_v38, %v2981_v28  ;;  %2617 = vmatprep.mubr.msk.f32.mxu1 %vm2796_vm0, %v2797_v8  ;;  %v1448_v31 = vmul.f32 %v3155_v38, %v2978_v27  ;;  %v1768_v35 = vmul.f32 %v3155_v38, %v2990_v36 }
 0x6d8   :  { %2625 = vmatprep.subr.mxu1 %v2797_v8  ;;  %v1929_v39 = vmul.f32 %v3155_v38, %v3002_v40  ;;  %v2382_v40 = vld [vmem:[%s3304_s12] ss:$0 sm:$0xff] }
 0x6d9   :  { %2606 = vmatpush3.msra.mxu0 %v1535_v41 }
 0x6da   :  { %2618 = vmatmul.mubr.msk.f32.vlgmr.msra.gmra.mrb[16].mxu1 %vm89_vm1, %v1682_v42  ;;  %2610 = vmatprep.subr.mxu0 %v2797_v8 }
 0x6db   :  { %2626 = vmatpush3.xpose.msk.msra.mxu1 %vm89_vm1, %v1273_v30  ;;  %2627 = vmatprep.mubr.msk.f32.mxu1 %vm2796_vm0, %v2797_v8 }
 0x6dc   :  { %2718 = vmatprep.subr.bf16.mxu1 %v2795_v0 }
 0x6de   :  { %2628 = vmatmul.mubr.msk.f32.vlgmr.msra.gmra.mrb[18].mxu1 %vm89_vm1, %v1843_v44 }
 0x6df   :  { %2643 = vmatprep.mubr.msk.f32.mxu1 %vm2796_vm0, %v2797_v8  ;;  %2720 = vmatpush3.bf16.msra.mxu1 %v2719_v21 }
 0x6e0   :  { %2721 = vmatprep.subr.bf16.mxu1 %v2795_v0 }
 0x6e3   :  { %2723 = vmatpush3.bf16.msra.mxu1 %v2722_v23 }
 0x6e4   :  { %2730 = vmatprep.subr.bf16.mxu1 %v2795_v0 }
 0x7a5   :  { %v1432_v28 = vpop.f32.mrb[12].mxu1 }
 0x7a6   :  { %v1436_v45 = vmul.f32 0.35355338, %v1432_v28  ;;  %v2599_v46 = vpop.f32.mrb[13].mxu1 }
 0x7a8   :  { %v1437_v43 = vsel %vm414_vm12, %v1436_v45, -inf }
 0x7a9   :  { %1438 = vmax.xlane.f32.xlu1 %v1437_v43  ;;  %v1519_v47 = vpop.f32.mrb[14].mxu1 }
 0x7aa   :  { %v1523_v48 = vmul.f32 0.35355338, %v1519_v47  ;;  %v2604_v49 = vpop.f32.mrb[15].mxu1 }
 0x7ac   :  { %v1524_v50 = vsel %vm414_vm12, %v1523_v48, -inf }
 0x7ad   :  { %1525 = vmax.xlane.f32.xlu0 %v1524_v50  ;;  %v1752_v51 = vpop.f32.mrb[16].mxu1 }
 0x7ae   :  { %v1756_v52 = vmul.f32 0.35355338, %v1752_v51  ;;  %v2619_v53 = vpop.f32.mrb[17].mxu1 }
 0x7b0   :  { %v1757_v54 = vsel %vm414_vm12, %v1756_v52, -inf }
 0x7b1   :  { %1758 = vmax.xlane.f32.xlu0 %v1757_v54  ;;  %v1913_v55 = vpop.f32.mrb[18].mxu1  ;;  %v2116_v54 = vld [vmem:[%s3305_s15 + $0x18] sm:$0xff] }
 0x7b2   :  { %v1917_v56 = vmul.f32 0.35355338, %v1913_v55  ;;  %v2629_v57 = vpop.f32.mrb[19].mxu1 }
 0x7b3   :  { %v2199_v57 = vld [vmem:[%s3306_s17 + $0x8] sm:$0xff] }
 0x7b4   :  { %v1918_v58 = vsel %vm414_vm12, %v1917_v56, -inf }
 0x7b5   :  { %1919 = vmax.xlane.f32.xlu1 %v1918_v58  ;;  %v2200_v58 = vld [vmem:[%s3306_s17 + $0x10] sm:$0xff] }
 0x836   :  { %v1439_v59 = vpop.xlane.xlu1 %1438 }
 0x837   :  { %v1440_v60 = vsub.f32 %v1436_v45, %v1439_v59 }
 0x839   :  { %v1441_v61 = vmul.f32 1.442695, %v1440_v60  ;;  %v2201_v60 = vld [vmem:[%s3306_s17 + $0x18] sm:$0xff] }
 0x83a   :  { %v1526_v62 = vpop.xlane.xlu0 %1525 }
 0x83b   :  { %2775 = vpow2.f32 %v1441_v61  ;;  %v1527_v63 = vsub.f32 %v1523_v48, %v1526_v62  ;;  %v2734_v61 = vpack.c.bf16 %v2201_v60, %v2200_v58  ;;  %v2202_v62 = vld [vmem:[%s3306_s17 + $0x20] sm:$0xff] }
 0x83d   :  { %v1528_v1 = vmul.f32 1.442695, %v1527_v63  ;;  %v2203_v63 = vld [vmem:[%s3306_s17 + $0x28] sm:$0xff] }
 0x83e   :  { %v1759_v2 = vpop.xlane.xlu0 %1758 }
 0x83f   :  { %2777 = vpow2.f32 %v1528_v1  ;;  %v1760_v3 = vsub.f32 %v1756_v52, %v1759_v2  ;;  %v2114_v52 = vld [vmem:[%s3305_s15 + $0x8] sm:$0xff]  ;;  %v2737_v1 = vpack.c.bf16 %v2203_v63, %v2202_v62 }
 0x841   :  { %v1761_v4 = vmul.f32 1.442695, %v1760_v3 }
 0x842   :  { %v1920_v5 = vpop.xlane.xlu1 %1919 }
 0x843   :  { %2779 = vpow2.f32 %v1761_v4  ;;  %v1921_v6 = vsub.f32 %v1917_v56, %v1920_v5  ;;  %v2198_v56 = vld [vmem:[%s3306_s17] sm:$0xff] }
 0x844   :  { %v2731_v59 = vpack.c.bf16 %v2199_v57, %v2198_v56 }
 0x845   :  { %v2776_v7 = vpop.eup %2775  ;;  %v1922_v9 = vmul.f32 1.442695, %v1921_v6  ;;  %v2384_v6 = vld [vmem:[%s3307_s13] ss:$0 sm:$0xff] }
 0x846   :  { %v1443_v10 = vsel %vm414_vm12, %v2776_v7, 0.0 }
 0x847   :  { %2781 = vpow2.f32 %v1922_v9  ;;  %1444 = vadd.xlane.f32.xlu1 %v1443_v10  ;;  %v2385_v9 = vld [vmem:[%s3308_s14] ss:$0 sm:$0xff] }
 0x849   :  { %v2778_v11 = vpop.eup %2777 }
 0x84a   :  { %v1530_v12 = vsel %vm414_vm12, %v2778_v11, 0.0 }
 0x84b   :  { %1531 = vadd.xlane.f32.xlu0 %v1530_v12  ;;  %v2205_v12 = vld [vmem:[%s3306_s17 + $0x38] sm:$0xff] }
 0x84d   :  { %v2780_v13 = vpop.eup %2779 }
 0x84e   :  { %v1763_v14 = vsel %vm414_vm12, %v2780_v13, 0.0 }
 0x84f   :  { %1764 = vadd.xlane.f32.xlu0 %v1763_v14  ;;  %v2386_v14 = vld [vmem:[%s3309_s16] ss:$0 sm:$0xff] }
 0x851   :  { %v2782_v15 = vpop.eup %2781 }
 0x852   :  { %v1924_v16 = vsel %vm414_vm12, %v2782_v15, 0.0 }
 0x853   :  { %1925 = vadd.xlane.f32.xlu1 %v1924_v16 }
 0x8d4   :  { %v1445_v25 = vpop.xlane.xlu1 %1444 }
 0x8d8   :  { %v1532_v24 = vpop.xlane.xlu0 %1531 }
 0x8d9   :  { %2783 = vrcp.f32 %v1532_v24 }
 0x8da   :  { %2785 = vrcp.f32 %v1445_v25 }
 0x8dc   :  { %v1765_v30 = vpop.xlane.xlu0 %1764 }
 0x8dd   :  { %2787 = vrcp.f32 %v1765_v30 }
 0x8e0   :  { %v1926_v34 = vpop.xlane.xlu1 %1925 }
 0x8e1   :  { %2789 = vrcp.f32 %v1926_v34 }
 0x8e3   :  { %v2784_v26 = vpop.eup %2783 }
 0x8e4   :  { %v1534_v29 = vmul.f32 %v2784_v26, %v2778_v11  ;;  %v2786_v32 = vpop.eup %2785 }
 0x8e5   :  { %v1447_v33 = vmul.f32 %v2786_v32, %v2776_v7 }
 0x8e6   :  { %2608 = vmatmul.mubr.msk.f32.vlgmr.msra.gmra.mrb[12].mxu0 %vm414_vm12, %v1534_v29 }
 0x8e7   :  { %2611 = vmatpush3.msra.mxu0 %v1448_v31  ;;  %2612 = vmatprep.mubr.msk.f32.mxu0 %vm2796_vm0, %v2797_v8  ;;  %v2788_v27 = vpop.eup %2787 }
 0x8e8   :  { %2620 = vmatprep.subr.mxu0 %v2797_v8  ;;  %v1767_v37 = vmul.f32 %v2788_v27, %v2780_v13 }
 0x8eb   :  { %v2790_v36 = vpop.eup %2789 }
 0x8ec   :  { %v1928_v41 = vmul.f32 %v2790_v36, %v2782_v15  ;;  %v2391_v36 = vld [vmem:[%s3312_s20] ss:$0 sm:$0xff] }
 0x8ee   :  { %2613 = vmatmul.mubr.msk.f32.vlgmr.msra.gmra.mrb[12].mxu0 %vm414_vm12, %v1447_v33 }
 0x8ef   :  { %2621 = vmatpush3.msra.mxu0 %v1768_v35  ;;  %2622 = vmatprep.mubr.msk.f32.mxu0 %vm2796_vm0, %v2797_v8 }
 0x8f0   :  { %2630 = vmatprep.subr.mxu0 %v2797_v8 }
 0x8f6   :  { %2623 = vmatmul.mubr.msk.f32.vlgmr.msra.gmra.mrb[12].mxu0 %vm414_vm12, %v1767_v37  ;;  %v2390_v37 = vld [vmem:[%s3311_s19] ss:$0 sm:$0xff] }
 0x8f7   :  { %2631 = vmatpush3.msra.mxu0 %v1929_v39  ;;  %2632 = vmatprep.mubr.msk.f32.mxu0 %vm2796_vm0, %v2797_v8 }
 0x8f8   :  { %2724 = vmatprep.subr.bf16.mxu0 %v2795_v0 }
 0x8fe   :  { %2633 = vmatmul.mubr.msk.f32.vlgmr.msra.gmra.mrb[12].mxu0 %vm414_vm12, %v1928_v41 }
 0x8ff   :  { %2654 = vmatprep.mubr.msk.f32.mxu0 %vm2796_vm0, %v2797_v8 }
 0x9d1   :  { %v1999_v42 = vpop.f32.mrb[12].mxu0 }
 0x9d2   :  { %v2634_v44 = vpop.f32.mrb[13].mxu0  ;;  %2644 = vmatmul.mubr.msk.f32.vlgmr.msra.gmra.mrb[20].mxu1 %vm89_vm1, %v1999_v42 }
 0x9d3   :  { %2673 = vmatprep.mubr.msk.f32.mxu1 %vm2796_vm0, %v2797_v8  ;;  %v2113_v8 = vld [vmem:[%s3305_s15] sm:$0xff]  ;;  %2732 = vmatpush3.bf16.msra.mxu1 %v2731_v59 }
 0x9d4   :  { %v2725_v53 = vpack.c.bf16 %v2114_v52, %v2113_v8  ;;  %2733 = vmatprep.subr.bf16.mxu1 %v2795_v0 }
 0x9d6   :  { %2726 = vmatpush3.bf16.msra.mxu0 %v2725_v53 }
 0x9d7   :  { %2727 = vmatprep.subr.bf16.mxu0 %v2795_v0  ;;  %2735 = vmatpush3.bf16.msra.mxu1 %v2734_v61 }
 0x9d8   :  { %2736 = vmatprep.subr.bf16.mxu1 %v2795_v0 }
 0x9db   :  { %2738 = vmatpush3.bf16.msra.mxu1 %v2737_v1 }
 0x9dc   :  { %2739 = vmatprep.subr.bf16.mxu1 %v2795_v0  ;;  %v2204_v0 = vld [vmem:[%s3306_s17 + $0x30] sm:$0xff] }
 0x9dd   :  { %v2740_v13 = vpack.c.bf16 %v2205_v12, %v2204_v0 }
 0x9df   :  { %2741 = vmatpush3.bf16.msra.mxu1 %v2740_v13 }
 0xaa5   :  { %v2079_v38 = vpop.f32.mrb[20].mxu1 }
 0xaa6   :  { %v2080_v28 = vadd.f32 %v2382_v40, %v2079_v38  ;;  %v2645_v45 = vpop.f32.mrb[21].mxu1 }
 0xaa8   :  { %v2083_v46 = vadd.f32 %v2080_v28, %v3115_v19  ;;  %v2115_v19 = vld [vmem:[%s3305_s15 + $0x10] sm:$0xff] }
 0xaa9   :  { %v2728_v55 = vpack.c.bf16 %v2116_v54, %v2115_v19 }
 0xaaa   :  { %v2086_v43 = vsel %vm89_vm1, %v2083_v46, 0.0 }
 0xaab   :  { %2087 = vadd.xlane.f32.xlu0 %v2086_v43  ;;  %2729 = vmatpush3.bf16.msra.mxu0 %v2728_v55 }
 0xb38   :  { %v2088_v47 = vpop.xlane.xlu0 %2087 }
 0xb39   :  { %v2089_v48 = vmul.f32 0.03125, %v2088_v47 }
 0xb3b   :  { %v2090_v49 = vsub.f32 %v2083_v46, %v2089_v48 }
 0xb3d   :  { %v2091_v50 = vmul.f32 %v2090_v49, %v2090_v49 }
 0xb3f   :  { %v2092_v51 = vsel %vm89_vm1, %v2091_v50, 0.0 }
 0xb40   :  { %2093 = vadd.xlane.f32.xlu1 %v2092_v51 }
 0xbcd   :  { %v2094_v2 = vpop.xlane.xlu1 %2093 }
 0xbce   :  { %v2095_v3 = vmul.f32 0.03125, %v2094_v2 }
 0xbd0   :  { %v2096_v4 = vadd.f32 1e-05, %v2095_v3 }
 0xbd2   :  { %2791 = vrsqrt.f32 %v2096_v4 }
 0xbdc   :  { %v2792_v5 = vpop.eup %2791 }
 0xbdd   :  { %v2098_v7 = vmul.f32 %v2792_v5, %v2090_v49 }
 0xbdf   :  { %v2105_v10 = vmul.f32 %v2384_v6, %v2098_v7 }
 0xbe1   :  { %v2112_v11 = vadd.f32 %v2385_v9, %v2105_v10 }
 0xbe3   :  { %2655 = vmatmul.mubr.msk.f32.vlgmr.msra.gmra.mrb[14].mxu0 %vm89_vm1, %v2112_v11 }
 0xcb6   :  { %v2193_v15 = vpop.f32.mrb[14].mxu0 }
 0xcb7   :  { %v2194_v16 = vadd.f32 %v2386_v14, %v2193_v15  ;;  %v2656_v17 = vpop.f32.mrb[15].mxu0 }
 0xcb9   :  { %v2197_v18 = vmax.f32 %v2194_v16, 0.0 }
 0xcbb   :  { %2674 = vmatmul.mubr.msk.f32.vlgmr.msra.gmra.mrb[22].mxu1 %vm2213_vm13, %v2197_v18 }
 0xd8e   :  { %v2283_v21 = vpop.f32.mrb[22].mxu1 }
 0xd8f   :  { %v2284_v22 = vadd.f32 %v2388_v20, %v2283_v21  ;;  %v2675_v23 = vpop.f32.mrb[23].mxu1 }
 0xd91   :  { %v2287_v24 = vadd.f32 %v2284_v22, %v2112_v11 }
 0xd93   :  { %v2290_v25 = vsel %vm89_vm1, %v2287_v24, 0.0 }
 0xd94   :  { %2291 = vadd.xlane.f32.xlu0 %v2290_v25 }
 0xe21   :  { %v2292_v26 = vpop.xlane.xlu0 %2291 }
 0xe22   :  { %v2293_v29 = vmul.f32 0.03125, %v2292_v26 }
 0xe24   :  { %v2294_v30 = vsub.f32 %v2287_v24, %v2293_v29 }
 0xe26   :  { %v2295_v31 = vmul.f32 %v2294_v30, %v2294_v30 }
 0xe28   :  { %v2296_v32 = vsel %vm89_vm1, %v2295_v31, 0.0 }
 0xe29   :  { %2297 = vadd.xlane.f32.xlu1 %v2296_v32 }
 0xeb6   :  { %v2298_v33 = vpop.xlane.xlu1 %2297 }
 0xeb7   :  { %v2299_v34 = vmul.f32 0.03125, %v2298_v33 }
 0xeb9   :  { %v2300_v35 = vadd.f32 1e-05, %v2299_v34 }
 0xebb   :  { %2793 = vrsqrt.f32 %v2300_v35 }
 0xec5   :  { %v2794_v27 = vpop.eup %2793 }
 0xec6   :  { %v2302_v39 = vmul.f32 %v2794_v27, %v2294_v30 }
 0xec8   :  { %v2309_v41 = vmul.f32 %v2390_v37, %v2302_v39 }
 0xeca   :  { %v2316_v42 = vadd.f32 %v2391_v36, %v2309_v41 }
 0xecc   :  { %2317 = vst.msk [vmem:[%s3313_s21] sm:$0xff] %vm89_vm1, %v2316_v42 }

</bundles_post_ra>
